<compile_context>
chip_gen: v7x
topology: tpu7x:2x2x1
jax: 0.10.0
libtpu: 0.0.40
codegen_flags: <defaults>
</compile_context>

<pallas_src>
import jax
import jax.numpy as jnp
from jax import lax
from jax.experimental import pallas as pl
from jax.experimental.pallas import tpu as pltpu
import numpy as np

N = 8          # number of images on the string
D = 2          # 2-D configuration space (x, y), as in the torch module
T = 9          # number of integration times -> T-1 RK4 steps
NSTEPS = T - 1

# coefficients of the synthetic potential (one per coordinate)
COEF = np.array([[1.0, 2.0]], dtype=np.float32)


def potential(z):
    """Synthetic analytic PES (stands in for the torch `potential` callable)."""
    return jnp.sum(jnp.asarray(COEF) * (z * z - 1.0) ** 2, axis=-1)


def _string_kernel(hh_ref, z0_ref, scalar_ref, out_ref):
    """Integrates dz/dt = parallel*(1-scalar) - grad with fixed-step RK4."""
    # ---- hoisted loop invariants (JAX does not CSE broadcasts / selects) ----
    row = lax.broadcasted_iota(jnp.int32, (N, D), 0)
    col = lax.broadcasted_iota(jnp.int32, (N, D), 1)
    interior = ((row > 0) & (row < N - 1)).astype(jnp.float32)       # endpoint rows -> 0
    coef_lane = jnp.where(col == 0, float(COEF[0, 0]), float(COEF[0, 1]))  # D==2 only
    gcoef = 4.0 * interior * coef_lane                               # (N, D), ends 0
    one_minus_scalar = jnp.broadcast_to(1.0 - scalar_ref[...], (N, D))
    eps = jnp.full((N, 1), 1e-20, jnp.float32)

    def rhs(z):
        # analytic, endpoint-masked gradient of the synthetic potential
        grad = gcoef * z * (z * z - 1.0)                             # (N, D)

        # central-difference tangent tg[i] ~ z[i+1]-z[i-1]; endpoint rows wrap
        # via the circular roll but contribute nothing because grad is 0 there.
        tg = pltpu.roll(z, shift=N - 1, axis=0) - pltpu.roll(z, shift=1, axis=0)

        # two independent row-dots (can overlap), plus EUP reciprocal off the
        # chain of the grad.tg reduce; no tau normalization needed.
        sumsq = jnp.sum(tg * tg, axis=1, keepdims=True)              # (N, 1)
        c = jnp.sum(grad * tg, axis=1, keepdims=True)                # (N, 1)
        inv2 = pl.reciprocal(jnp.maximum(sumsq, eps), approx=False)  # exact 1/x

        parallel = (c * inv2) * tg                                   # (N, D)
        # -perp - scalar*parallel == parallel*(1-scalar) - grad
        return parallel * one_minus_scalar - grad

    def step(i, z):
        base = 3 * i
        h = hh_ref[base]
        half_h = hh_ref[base + 1]
        h6 = hh_ref[base + 2]
        k1 = rhs(z)
        k2 = rhs(z + half_h * k1)
        k3 = rhs(z + half_h * k2)
        k4 = rhs(z + h * k3)
        return z + h6 * (k1 + 2.0 * (k2 + k3) + k4)

    out_ref[...] = lax.fori_loop(0, NSTEPS, step, z0_ref[...], unroll=True)


@jax.jit
def differentiable_string_forward(t, z0, scalar):
    """JAX wrapper: returns zN = RK4-odeint(ODE, z0, t)[-1]."""
    dt = t[1:] - t[:-1]                                              # (T-1,)
    # flat SMEM layout: [h0, h0/2, h0/6, h1, h1/2, h1/6, ...]
    hh = jnp.stack([dt, 0.5 * dt, dt / 6.0], axis=1).reshape(-1).astype(jnp.float32)
    return pl.pallas_call(
        _string_kernel,
        out_shape=jax.ShapeDtypeStruct((N, D), jnp.float32),
        in_specs=[
            pl.BlockSpec(memory_space=pltpu.MemorySpace.SMEM),   # hh     (3*(T-1),)
            pl.BlockSpec(memory_space=pltpu.MemorySpace.VMEM),   # z0     (N, D)
            pl.BlockSpec(memory_space=pltpu.MemorySpace.VMEM),   # scalar (N, 1)
        ],
        out_specs=pl.BlockSpec(memory_space=pltpu.MemorySpace.VMEM),
    )(hh, z0, scalar)


# ---------------- pure-JAX reference (mirrors the torch math) ----------------
def _rhs_ref(z, scalar):
    coef = jnp.asarray(COEF, dtype=jnp.float32)
    grad = 4.0 * coef * z * (z * z - 1.0)
    grad = grad.at[0].set(0.0).at[-1].set(0.0)
    tg = z[2:] - z[:-2]
    norm = jnp.sqrt(jnp.sum(tg * tg, axis=1, keepdims=True))
    tau = jnp.concatenate(
        [jnp.zeros((1, D), jnp.float32), tg / norm, jnp.zeros((1, D), jnp.float32)],
        axis=0,
    )
    dot = jnp.sum(grad * tau, axis=1, keepdims=True)
    par = dot * tau
    perp = grad - par
    return -perp - scalar * par


def _forward_ref(t, z0, scalar):
    z = z0
    for i in range(t.shape[0] - 1):
        h = t[i + 1] - t[i]
        k1 = _rhs_ref(z, scalar)
        k2 = _rhs_ref(z + 0.5 * h * k1, scalar)
        k3 = _rhs_ref(z + 0.5 * h * k2, scalar)
        k4 = _rhs_ref(z + h * k3, scalar)
        z = z + (h / 6.0) * (k1 + 2.0 * k2 + 2.0 * k3 + k4)
    return z


if __name__ == "__main__":
    key = jax.random.PRNGKey(0)

    # synthetic endpoints (stand-ins for read('initial.traj') / read('final.traj'))
    initial = (-1.0, 0.5)
    final = (1.0, -0.5)

    # __init__: z0 = linspace path between the endpoints, scalar = zeros((N, 1))
    z0 = jnp.stack(
        [
            jnp.linspace(initial[0], final[0], N, dtype=jnp.float32),
            jnp.linspace(initial[1], final[1], N, dtype=jnp.float32),
        ],
        axis=1,
    )
    # deterministic perturbation of interior images so the dynamics are nontrivial
    pert = 0.05 * jax.random.normal(key, (N, D), dtype=jnp.float32)
    pert = pert.at[0].set(0.0).at[-1].set(0.0)
    z0 = z0 + pert

    scalar = jnp.zeros((N, 1), dtype=jnp.float32)          # ODE.scalar parameter
    t = jnp.linspace(0.0, 0.5, T, dtype=jnp.float32)       # integration times

    zN = differentiable_string_forward(t, z0, scalar)
    zN = jax.block_until_ready(zN)

    zN_ref = _forward_ref(t, z0, scalar)
    np.testing.assert_allclose(np.asarray(zN), np.asarray(zN_ref), rtol=1e-4, atol=1e-5)

    print("KERNEL_OK")
</pallas_src>

<mosaic_0001>
module attributes {stable_mosaic.version = 11 : i64} {
  func.func @_string_kernel(%arg0: memref<24xf32, #tpu.memory_space<smem>>, %arg1: memref<8x2xf32, #tpu.memory_space<vmem>>, %arg2: memref<8x1xf32, #tpu.memory_space<vmem>>, %arg3: memref<8x2xf32, #tpu.memory_space<vmem>>) attributes {dimension_semantics = [], scalar_prefetch = 0 : i64, scratch_operands = 0 : i64, tpu.core_type = #tpu.core_type<tc>} {
    %0 = tpu.iota {dimensions = array<i32: 0>} : vector<8x2xi32>
    %1 = tpu.iota {dimensions = array<i32: 1>} : vector<8x2xi32>
    %c0_i32 = arith.constant 0 : i32
    %2 = vector.broadcast %c0_i32 : i32 to vector<8x2xi32>
    %3 = arith.cmpi sgt, %0, %2 : vector<8x2xi32>
    %c7_i32 = arith.constant 7 : i32
    %4 = vector.broadcast %c7_i32 : i32 to vector<8x2xi32>
    %5 = arith.cmpi slt, %0, %4 : vector<8x2xi32>
    %6 = arith.andi %3, %5 : vector<8x2xi1>
    %7 = arith.extui %6 : vector<8x2xi1> to vector<8x2xi32>
    %8 = arith.sitofp %7 : vector<8x2xi32> to vector<8x2xf32>
    %c0_i32_0 = arith.constant 0 : i32
    %9 = vector.broadcast %c0_i32_0 : i32 to vector<8x2xi32>
    %10 = arith.cmpi eq, %1, %9 : vector<8x2xi32>
    %cst = arith.constant 1.000000e+00 : f32
    %cst_1 = arith.constant 2.000000e+00 : f32
    %11 = vector.broadcast %cst : f32 to vector<8x2xf32>
    %12 = vector.broadcast %cst_1 : f32 to vector<8x2xf32>
    %13 = arith.select %10, %11, %12 : vector<8x2xi1>, vector<8x2xf32>
    %cst_2 = arith.constant 4.000000e+00 : f32
    %14 = vector.broadcast %cst_2 : f32 to vector<8x2xf32>
    %15 = arith.mulf %14, %8 : vector<8x2xf32>
    %16 = arith.mulf %15, %13 : vector<8x2xf32>
    %c0 = arith.constant 0 : index
    %c0_3 = arith.constant 0 : index
    %17 = vector.load %arg2[%c0, %c0_3] : memref<8x1xf32, #tpu.memory_space<vmem>>, vector<8x1xf32>
    %cst_4 = arith.constant 1.000000e+00 : f32
    %18 = vector.broadcast %cst_4 : f32 to vector<8x1xf32>
    %19 = arith.subf %18, %17 : vector<8x1xf32>
    %20 = vector.shape_cast %19 : vector<8x1xf32> to vector<8x1xf32>
    %21 = vector.broadcast %20 : vector<8x1xf32> to vector<8x2xf32>
    %cst_5 = arith.constant 9.99999968E-21 : f32
    %22 = vector.broadcast %cst_5 : f32 to vector<8x1xf32>
    %c0_6 = arith.constant 0 : index
    %c0_7 = arith.constant 0 : index
    %23 = vector.load %arg1[%c0_6, %c0_7] : memref<8x2xf32, #tpu.memory_space<vmem>>, vector<8x2xf32>
    %c0_i32_8 = arith.constant 0 : i32
    %c3_i32 = arith.constant 3 : i32
    %24 = arith.muli %c3_i32, %c0_i32_8 : i32
    %25 = arith.index_cast %24 : i32 to index
    %26 = memref.load %arg0[%25] : memref<24xf32, #tpu.memory_space<smem>>
    %c1_i32 = arith.constant 1 : i32
    %27 = arith.addi %24, %c1_i32 : i32
    %28 = arith.index_cast %27 : i32 to index
    %29 = memref.load %arg0[%28] : memref<24xf32, #tpu.memory_space<smem>>
    %c2_i32 = arith.constant 2 : i32
    %30 = arith.addi %24, %c2_i32 : i32
    %31 = arith.index_cast %30 : i32 to index
    %32 = memref.load %arg0[%31] : memref<24xf32, #tpu.memory_space<smem>>
    %33 = arith.mulf %16, %23 : vector<8x2xf32>
    %34 = arith.mulf %23, %23 : vector<8x2xf32>
    %cst_9 = arith.constant 1.000000e+00 : f32
    %35 = vector.broadcast %cst_9 : f32 to vector<8x2xf32>
    %36 = arith.subf %34, %35 : vector<8x2xf32>
    %37 = arith.mulf %33, %36 : vector<8x2xf32>
    %c7_i32_10 = arith.constant 7 : i32
    %38 = tpu.dynamic_rotate %23 by %c7_i32_10 dim 0 : vector<8x2xf32>, i32 -> vector<8x2xf32>
    %c1_i32_11 = arith.constant 1 : i32
    %39 = tpu.dynamic_rotate %23 by %c1_i32_11 dim 0 : vector<8x2xf32>, i32 -> vector<8x2xf32>
    %40 = arith.subf %38, %39 : vector<8x2xf32>
    %41 = arith.mulf %40, %40 : vector<8x2xf32>
    %cst_12 = arith.constant dense<0.000000e+00> : vector<8xf32>
    %42 = vector.multi_reduction <add>, %41, %cst_12 [1] : vector<8x2xf32> to vector<8xf32>
    %43 = vector.shape_cast %42 : vector<8xf32> to vector<8x1xf32>
    %44 = arith.mulf %37, %40 : vector<8x2xf32>
    %cst_13 = arith.constant dense<0.000000e+00> : vector<8xf32>
    %45 = vector.multi_reduction <add>, %44, %cst_13 [1] : vector<8x2xf32> to vector<8xf32>
    %46 = vector.shape_cast %45 : vector<8xf32> to vector<8x1xf32>
    %47 = arith.maximumf %43, %22 : vector<8x1xf32>
    %48 = tpu.reciprocal %47 : vector<8x1xf32> -> vector<8x1xf32>
    %49 = arith.mulf %46, %48 : vector<8x1xf32>
    %50 = vector.broadcast %49 : vector<8x1xf32> to vector<8x2xf32>
    %51 = arith.mulf %50, %40 : vector<8x2xf32>
    %52 = arith.mulf %51, %21 : vector<8x2xf32>
    %53 = arith.subf %52, %37 : vector<8x2xf32>
    %54 = vector.broadcast %29 : f32 to vector<8x2xf32>
    %55 = arith.mulf %54, %53 : vector<8x2xf32>
    %56 = arith.addf %23, %55 : vector<8x2xf32>
    %57 = arith.mulf %16, %56 : vector<8x2xf32>
    %58 = arith.mulf %56, %56 : vector<8x2xf32>
    %cst_14 = arith.constant 1.000000e+00 : f32
    %59 = vector.broadcast %cst_14 : f32 to vector<8x2xf32>
    %60 = arith.subf %58, %59 : vector<8x2xf32>
    %61 = arith.mulf %57, %60 : vector<8x2xf32>
    %c7_i32_15 = arith.constant 7 : i32
    %62 = tpu.dynamic_rotate %56 by %c7_i32_15 dim 0 : vector<8x2xf32>, i32 -> vector<8x2xf32>
    %c1_i32_16 = arith.constant 1 : i32
    %63 = tpu.dynamic_rotate %56 by %c1_i32_16 dim 0 : vector<8x2xf32>, i32 -> vector<8x2xf32>
    %64 = arith.subf %62, %63 : vector<8x2xf32>
    %65 = arith.mulf %64, %64 : vector<8x2xf32>
    %cst_17 = arith.constant dense<0.000000e+00> : vector<8xf32>
    %66 = vector.multi_reduction <add>, %65, %cst_17 [1] : vector<8x2xf32> to vector<8xf32>
    %67 = vector.shape_cast %66 : vector<8xf32> to vector<8x1xf32>
    %68 = arith.mulf %61, %64 : vector<8x2xf32>
    %cst_18 = arith.constant dense<0.000000e+00> : vector<8xf32>
    %69 = vector.multi_reduction <add>, %68, %cst_18 [1] : vector<8x2xf32> to vector<8xf32>
    %70 = vector.shape_cast %69 : vector<8xf32> to vector<8x1xf32>
    %71 = arith.maximumf %67, %22 : vector<8x1xf32>
    %72 = tpu.reciprocal %71 : vector<8x1xf32> -> vector<8x1xf32>
    %73 = arith.mulf %70, %72 : vector<8x1xf32>
    %74 = vector.broadcast %73 : vector<8x1xf32> to vector<8x2xf32>
    %75 = arith.mulf %74, %64 : vector<8x2xf32>
    %76 = arith.mulf %75, %21 : vector<8x2xf32>
    %77 = arith.subf %76, %61 : vector<8x2xf32>
    %78 = vector.broadcast %29 : f32 to vector<8x2xf32>
    %79 = arith.mulf %78, %77 : vector<8x2xf32>
    %80 = arith.addf %23, %79 : vector<8x2xf32>
    %81 = arith.mulf %16, %80 : vector<8x2xf32>
    %82 = arith.mulf %80, %80 : vector<8x2xf32>
    %cst_19 = arith.constant 1.000000e+00 : f32
    %83 = vector.broadcast %cst_19 : f32 to vector<8x2xf32>
    %84 = arith.subf %82, %83 : vector<8x2xf32>
    %85 = arith.mulf %81, %84 : vector<8x2xf32>
    %c7_i32_20 = arith.constant 7 : i32
    %86 = tpu.dynamic_rotate %80 by %c7_i32_20 dim 0 : vector<8x2xf32>, i32 -> vector<8x2xf32>
    %c1_i32_21 = arith.constant 1 : i32
    %87 = tpu.dynamic_rotate %80 by %c1_i32_21 dim 0 : vector<8x2xf32>, i32 -> vector<8x2xf32>
    %88 = arith.subf %86, %87 : vector<8x2xf32>
    %89 = arith.mulf %88, %88 : vector<8x2xf32>
    %cst_22 = arith.constant dense<0.000000e+00> : vector<8xf32>
    %90 = vector.multi_reduction <add>, %89, %cst_22 [1] : vector<8x2xf32> to vector<8xf32>
    %91 = vector.shape_cast %90 : vector<8xf32> to vector<8x1xf32>
    %92 = arith.mulf %85, %88 : vector<8x2xf32>
    %cst_23 = arith.constant dense<0.000000e+00> : vector<8xf32>
    %93 = vector.multi_reduction <add>, %92, %cst_23 [1] : vector<8x2xf32> to vector<8xf32>
    %94 = vector.shape_cast %93 : vector<8xf32> to vector<8x1xf32>
    %95 = arith.maximumf %91, %22 : vector<8x1xf32>
    %96 = tpu.reciprocal %95 : vector<8x1xf32> -> vector<8x1xf32>
    %97 = arith.mulf %94, %96 : vector<8x1xf32>
    %98 = vector.broadcast %97 : vector<8x1xf32> to vector<8x2xf32>
    %99 = arith.mulf %98, %88 : vector<8x2xf32>
    %100 = arith.mulf %99, %21 : vector<8x2xf32>
    %101 = arith.subf %100, %85 : vector<8x2xf32>
    %102 = vector.broadcast %26 : f32 to vector<8x2xf32>
    %103 = arith.mulf %102, %101 : vector<8x2xf32>
    %104 = arith.addf %23, %103 : vector<8x2xf32>
    %105 = arith.mulf %16, %104 : vector<8x2xf32>
    %106 = arith.mulf %104, %104 : vector<8x2xf32>
    %cst_24 = arith.constant 1.000000e+00 : f32
    %107 = vector.broadcast %cst_24 : f32 to vector<8x2xf32>
    %108 = arith.subf %106, %107 : vector<8x2xf32>
    %109 = arith.mulf %105, %108 : vector<8x2xf32>
    %c7_i32_25 = arith.constant 7 : i32
    %110 = tpu.dynamic_rotate %104 by %c7_i32_25 dim 0 : vector<8x2xf32>, i32 -> vector<8x2xf32>
    %c1_i32_26 = arith.constant 1 : i32
    %111 = tpu.dynamic_rotate %104 by %c1_i32_26 dim 0 : vector<8x2xf32>, i32 -> vector<8x2xf32>
    %112 = arith.subf %110, %111 : vector<8x2xf32>
    %113 = arith.mulf %112, %112 : vector<8x2xf32>
    %cst_27 = arith.constant dense<0.000000e+00> : vector<8xf32>
    %114 = vector.multi_reduction <add>, %113, %cst_27 [1] : vector<8x2xf32> to vector<8xf32>
    %115 = vector.shape_cast %114 : vector<8xf32> to vector<8x1xf32>
    %116 = arith.mulf %109, %112 : vector<8x2xf32>
    %cst_28 = arith.constant dense<0.000000e+00> : vector<8xf32>
    %117 = vector.multi_reduction <add>, %116, %cst_28 [1] : vector<8x2xf32> to vector<8xf32>
    %118 = vector.shape_cast %117 : vector<8xf32> to vector<8x1xf32>
    %119 = arith.maximumf %115, %22 : vector<8x1xf32>
    %120 = tpu.reciprocal %119 : vector<8x1xf32> -> vector<8x1xf32>
    %121 = arith.mulf %118, %120 : vector<8x1xf32>
    %122 = vector.broadcast %121 : vector<8x1xf32> to vector<8x2xf32>
    %123 = arith.mulf %122, %112 : vector<8x2xf32>
    %124 = arith.mulf %123, %21 : vector<8x2xf32>
    %125 = arith.subf %124, %109 : vector<8x2xf32>
    %126 = arith.addf %77, %101 : vector<8x2xf32>
    %cst_29 = arith.constant 2.000000e+00 : f32
    %127 = vector.broadcast %cst_29 : f32 to vector<8x2xf32>
    %128 = arith.mulf %127, %126 : vector<8x2xf32>
    %129 = arith.addf %53, %128 : vector<8x2xf32>
    %130 = arith.addf %129, %125 : vector<8x2xf32>
    %131 = vector.broadcast %32 : f32 to vector<8x2xf32>
    %132 = arith.mulf %131, %130 : vector<8x2xf32>
    %133 = arith.addf %23, %132 : vector<8x2xf32>
    %c1_i32_30 = arith.constant 1 : i32
    %c3_i32_31 = arith.constant 3 : i32
    %134 = arith.muli %c3_i32_31, %c1_i32_30 : i32
    %135 = arith.index_cast %134 : i32 to index
    %136 = memref.load %arg0[%135] : memref<24xf32, #tpu.memory_space<smem>>
    %c1_i32_32 = arith.constant 1 : i32
    %137 = arith.addi %134, %c1_i32_32 : i32
    %138 = arith.index_cast %137 : i32 to index
    %139 = memref.load %arg0[%138] : memref<24xf32, #tpu.memory_space<smem>>
    %c2_i32_33 = arith.constant 2 : i32
    %140 = arith.addi %134, %c2_i32_33 : i32
    %141 = arith.index_cast %140 : i32 to index
    %142 = memref.load %arg0[%141] : memref<24xf32, #tpu.memory_space<smem>>
    %143 = arith.mulf %16, %133 : vector<8x2xf32>
    %144 = arith.mulf %133, %133 : vector<8x2xf32>
    %cst_34 = arith.constant 1.000000e+00 : f32
    %145 = vector.broadcast %cst_34 : f32 to vector<8x2xf32>
    %146 = arith.subf %144, %145 : vector<8x2xf32>
    %147 = arith.mulf %143, %146 : vector<8x2xf32>
    %c7_i32_35 = arith.constant 7 : i32
    %148 = tpu.dynamic_rotate %133 by %c7_i32_35 dim 0 : vector<8x2xf32>, i32 -> vector<8x2xf32>
    %c1_i32_36 = arith.constant 1 : i32
    %149 = tpu.dynamic_rotate %133 by %c1_i32_36 dim 0 : vector<8x2xf32>, i32 -> vector<8x2xf32>
    %150 = arith.subf %148, %149 : vector<8x2xf32>
    %151 = arith.mulf %150, %150 : vector<8x2xf32>
    %cst_37 = arith.constant dense<0.000000e+00> : vector<8xf32>
    %152 = vector.multi_reduction <add>, %151, %cst_37 [1] : vector<8x2xf32> to vector<8xf32>
    %153 = vector.shape_cast %152 : vector<8xf32> to vector<8x1xf32>
    %154 = arith.mulf %147, %150 : vector<8x2xf32>
    %cst_38 = arith.constant dense<0.000000e+00> : vector<8xf32>
    %155 = vector.multi_reduction <add>, %154, %cst_38 [1] : vector<8x2xf32> to vector<8xf32>
    %156 = vector.shape_cast %155 : vector<8xf32> to vector<8x1xf32>
    %157 = arith.maximumf %153, %22 : vector<8x1xf32>
    %158 = tpu.reciprocal %157 : vector<8x1xf32> -> vector<8x1xf32>
    %159 = arith.mulf %156, %158 : vector<8x1xf32>
    %160 = vector.broadcast %159 : vector<8x1xf32> to vector<8x2xf32>
    %161 = arith.mulf %160, %150 : vector<8x2xf32>
    %162 = arith.mulf %161, %21 : vector<8x2xf32>
    %163 = arith.subf %162, %147 : vector<8x2xf32>
    %164 = vector.broadcast %139 : f32 to vector<8x2xf32>
    %165 = arith.mulf %164, %163 : vector<8x2xf32>
    %166 = arith.addf %133, %165 : vector<8x2xf32>
    %167 = arith.mulf %16, %166 : vector<8x2xf32>
    %168 = arith.mulf %166, %166 : vector<8x2xf32>
    %cst_39 = arith.constant 1.000000e+00 : f32
    %169 = vector.broadcast %cst_39 : f32 to vector<8x2xf32>
    %170 = arith.subf %168, %169 : vector<8x2xf32>
    %171 = arith.mulf %167, %170 : vector<8x2xf32>
    %c7_i32_40 = arith.constant 7 : i32
    %172 = tpu.dynamic_rotate %166 by %c7_i32_40 dim 0 : vector<8x2xf32>, i32 -> vector<8x2xf32>
    %c1_i32_41 = arith.constant 1 : i32
    %173 = tpu.dynamic_rotate %166 by %c1_i32_41 dim 0 : vector<8x2xf32>, i32 -> vector<8x2xf32>
    %174 = arith.subf %172, %173 : vector<8x2xf32>
    %175 = arith.mulf %174, %174 : vector<8x2xf32>
    %cst_42 = arith.constant dense<0.000000e+00> : vector<8xf32>
    %176 = vector.multi_reduction <add>, %175, %cst_42 [1] : vector<8x2xf32> to vector<8xf32>
    %177 = vector.shape_cast %176 : vector<8xf32> to vector<8x1xf32>
    %178 = arith.mulf %171, %174 : vector<8x2xf32>
    %cst_43 = arith.constant dense<0.000000e+00> : vector<8xf32>
    %179 = vector.multi_reduction <add>, %178, %cst_43 [1] : vector<8x2xf32> to vector<8xf32>
    %180 = vector.shape_cast %179 : vector<8xf32> to vector<8x1xf32>
    %181 = arith.maximumf %177, %22 : vector<8x1xf32>
    %182 = tpu.reciprocal %181 : vector<8x1xf32> -> vector<8x1xf32>
    %183 = arith.mulf %180, %182 : vector<8x1xf32>
    %184 = vector.broadcast %183 : vector<8x1xf32> to vector<8x2xf32>
    %185 = arith.mulf %184, %174 : vector<8x2xf32>
    %186 = arith.mulf %185, %21 : vector<8x2xf32>
    %187 = arith.subf %186, %171 : vector<8x2xf32>
    %188 = vector.broadcast %139 : f32 to vector<8x2xf32>
    %189 = arith.mulf %188, %187 : vector<8x2xf32>
    %190 = arith.addf %133, %189 : vector<8x2xf32>
    %191 = arith.mulf %16, %190 : vector<8x2xf32>
    %192 = arith.mulf %190, %190 : vector<8x2xf32>
    %cst_44 = arith.constant 1.000000e+00 : f32
    %193 = vector.broadcast %cst_44 : f32 to vector<8x2xf32>
    %194 = arith.subf %192, %193 : vector<8x2xf32>
    %195 = arith.mulf %191, %194 : vector<8x2xf32>
    %c7_i32_45 = arith.constant 7 : i32
    %196 = tpu.dynamic_rotate %190 by %c7_i32_45 dim 0 : vector<8x2xf32>, i32 -> vector<8x2xf32>
    %c1_i32_46 = arith.constant 1 : i32
    %197 = tpu.dynamic_rotate %190 by %c1_i32_46 dim 0 : vector<8x2xf32>, i32 -> vector<8x2xf32>
    %198 = arith.subf %196, %197 : vector<8x2xf32>
    %199 = arith.mulf %198, %198 : vector<8x2xf32>
    %cst_47 = arith.constant dense<0.000000e+00> : vector<8xf32>
    %200 = vector.multi_reduction <add>, %199, %cst_47 [1] : vector<8x2xf32> to vector<8xf32>
    %201 = vector.shape_cast %200 : vector<8xf32> to vector<8x1xf32>
    %202 = arith.mulf %195, %198 : vector<8x2xf32>
    %cst_48 = arith.constant dense<0.000000e+00> : vector<8xf32>
    %203 = vector.multi_reduction <add>, %202, %cst_48 [1] : vector<8x2xf32> to vector<8xf32>
    %204 = vector.shape_cast %203 : vector<8xf32> to vector<8x1xf32>
    %205 = arith.maximumf %201, %22 : vector<8x1xf32>
    %206 = tpu.reciprocal %205 : vector<8x1xf32> -> vector<8x1xf32>
    %207 = arith.mulf %204, %206 : vector<8x1xf32>
    %208 = vector.broadcast %207 : vector<8x1xf32> to vector<8x2xf32>
    %209 = arith.mulf %208, %198 : vector<8x2xf32>
    %210 = arith.mulf %209, %21 : vector<8x2xf32>
    %211 = arith.subf %210, %195 : vector<8x2xf32>
    %212 = vector.broadcast %136 : f32 to vector<8x2xf32>
    %213 = arith.mulf %212, %211 : vector<8x2xf32>
    %214 = arith.addf %133, %213 : vector<8x2xf32>
    %215 = arith.mulf %16, %214 : vector<8x2xf32>
    %216 = arith.mulf %214, %214 : vector<8x2xf32>
    %cst_49 = arith.constant 1.000000e+00 : f32
    %217 = vector.broadcast %cst_49 : f32 to vector<8x2xf32>
    %218 = arith.subf %216, %217 : vector<8x2xf32>
    %219 = arith.mulf %215, %218 : vector<8x2xf32>
    %c7_i32_50 = arith.constant 7 : i32
    %220 = tpu.dynamic_rotate %214 by %c7_i32_50 dim 0 : vector<8x2xf32>, i32 -> vector<8x2xf32>
    %c1_i32_51 = arith.constant 1 : i32
    %221 = tpu.dynamic_rotate %214 by %c1_i32_51 dim 0 : vector<8x2xf32>, i32 -> vector<8x2xf32>
    %222 = arith.subf %220, %221 : vector<8x2xf32>
    %223 = arith.mulf %222, %222 : vector<8x2xf32>
    %cst_52 = arith.constant dense<0.000000e+00> : vector<8xf32>
    %224 = vector.multi_reduction <add>, %223, %cst_52 [1] : vector<8x2xf32> to vector<8xf32>
    %225 = vector.shape_cast %224 : vector<8xf32> to vector<8x1xf32>
    %226 = arith.mulf %219, %222 : vector<8x2xf32>
    %cst_53 = arith.constant dense<0.000000e+00> : vector<8xf32>
    %227 = vector.multi_reduction <add>, %226, %cst_53 [1] : vector<8x2xf32> to vector<8xf32>
    %228 = vector.shape_cast %227 : vector<8xf32> to vector<8x1xf32>
    %229 = arith.maximumf %225, %22 : vector<8x1xf32>
    %230 = tpu.reciprocal %229 : vector<8x1xf32> -> vector<8x1xf32>
    %231 = arith.mulf %228, %230 : vector<8x1xf32>
    %232 = vector.broadcast %231 : vector<8x1xf32> to vector<8x2xf32>
    %233 = arith.mulf %232, %222 : vector<8x2xf32>
    %234 = arith.mulf %233, %21 : vector<8x2xf32>
    %235 = arith.subf %234, %219 : vector<8x2xf32>
    %236 = arith.addf %187, %211 : vector<8x2xf32>
    %cst_54 = arith.constant 2.000000e+00 : f32
    %237 = vector.broadcast %cst_54 : f32 to vector<8x2xf32>
    %238 = arith.mulf %237, %236 : vector<8x2xf32>
    %239 = arith.addf %163, %238 : vector<8x2xf32>
    %240 = arith.addf %239, %235 : vector<8x2xf32>
    %241 = vector.broadcast %142 : f32 to vector<8x2xf32>
    %242 = arith.mulf %241, %240 : vector<8x2xf32>
    %243 = arith.addf %133, %242 : vector<8x2xf32>
    %c2_i32_55 = arith.constant 2 : i32
    %c3_i32_56 = arith.constant 3 : i32
    %244 = arith.muli %c3_i32_56, %c2_i32_55 : i32
    %245 = arith.index_cast %244 : i32 to index
    %246 = memref.load %arg0[%245] : memref<24xf32, #tpu.memory_space<smem>>
    %c1_i32_57 = arith.constant 1 : i32
    %247 = arith.addi %244, %c1_i32_57 : i32
    %248 = arith.index_cast %247 : i32 to index
    %249 = memref.load %arg0[%248] : memref<24xf32, #tpu.memory_space<smem>>
    %c2_i32_58 = arith.constant 2 : i32
    %250 = arith.addi %244, %c2_i32_58 : i32
    %251 = arith.index_cast %250 : i32 to index
    %252 = memref.load %arg0[%251] : memref<24xf32, #tpu.memory_space<smem>>
    %253 = arith.mulf %16, %243 : vector<8x2xf32>
    %254 = arith.mulf %243, %243 : vector<8x2xf32>
    %cst_59 = arith.constant 1.000000e+00 : f32
    %255 = vector.broadcast %cst_59 : f32 to vector<8x2xf32>
    %256 = arith.subf %254, %255 : vector<8x2xf32>
    %257 = arith.mulf %253, %256 : vector<8x2xf32>
    %c7_i32_60 = arith.constant 7 : i32
    %258 = tpu.dynamic_rotate %243 by %c7_i32_60 dim 0 : vector<8x2xf32>, i32 -> vector<8x2xf32>
    %c1_i32_61 = arith.constant 1 : i32
    %259 = tpu.dynamic_rotate %243 by %c1_i32_61 dim 0 : vector<8x2xf32>, i32 -> vector<8x2xf32>
    %260 = arith.subf %258, %259 : vector<8x2xf32>
    %261 = arith.mulf %260, %260 : vector<8x2xf32>
    %cst_62 = arith.constant dense<0.000000e+00> : vector<8xf32>
    %262 = vector.multi_reduction <add>, %261, %cst_62 [1] : vector<8x2xf32> to vector<8xf32>
    %263 = vector.shape_cast %262 : vector<8xf32> to vector<8x1xf32>
    %264 = arith.mulf %257, %260 : vector<8x2xf32>
    %cst_63 = arith.constant dense<0.000000e+00> : vector<8xf32>
    %265 = vector.multi_reduction <add>, %264, %cst_63 [1] : vector<8x2xf32> to vector<8xf32>
    %266 = vector.shape_cast %265 : vector<8xf32> to vector<8x1xf32>
    %267 = arith.maximumf %263, %22 : vector<8x1xf32>
    %268 = tpu.reciprocal %267 : vector<8x1xf32> -> vector<8x1xf32>
    %269 = arith.mulf %266, %268 : vector<8x1xf32>
    %270 = vector.broadcast %269 : vector<8x1xf32> to vector<8x2xf32>
    %271 = arith.mulf %270, %260 : vector<8x2xf32>
    %272 = arith.mulf %271, %21 : vector<8x2xf32>
    %273 = arith.subf %272, %257 : vector<8x2xf32>
    %274 = vector.broadcast %249 : f32 to vector<8x2xf32>
    %275 = arith.mulf %274, %273 : vector<8x2xf32>
    %276 = arith.addf %243, %275 : vector<8x2xf32>
    %277 = arith.mulf %16, %276 : vector<8x2xf32>
    %278 = arith.mulf %276, %276 : vector<8x2xf32>
    %cst_64 = arith.constant 1.000000e+00 : f32
    %279 = vector.broadcast %cst_64 : f32 to vector<8x2xf32>
    %280 = arith.subf %278, %279 : vector<8x2xf32>
    %281 = arith.mulf %277, %280 : vector<8x2xf32>
    %c7_i32_65 = arith.constant 7 : i32
    %282 = tpu.dynamic_rotate %276 by %c7_i32_65 dim 0 : vector<8x2xf32>, i32 -> vector<8x2xf32>
    %c1_i32_66 = arith.constant 1 : i32
    %283 = tpu.dynamic_rotate %276 by %c1_i32_66 dim 0 : vector<8x2xf32>, i32 -> vector<8x2xf32>
    %284 = arith.subf %282, %283 : vector<8x2xf32>
    %285 = arith.mulf %284, %284 : vector<8x2xf32>
    %cst_67 = arith.constant dense<0.000000e+00> : vector<8xf32>
    %286 = vector.multi_reduction <add>, %285, %cst_67 [1] : vector<8x2xf32> to vector<8xf32>
    %287 = vector.shape_cast %286 : vector<8xf32> to vector<8x1xf32>
    %288 = arith.mulf %281, %284 : vector<8x2xf32>
    %cst_68 = arith.constant dense<0.000000e+00> : vector<8xf32>
    %289 = vector.multi_reduction <add>, %288, %cst_68 [1] : vector<8x2xf32> to vector<8xf32>
    %290 = vector.shape_cast %289 : vector<8xf32> to vector<8x1xf32>
    %291 = arith.maximumf %287, %22 : vector<8x1xf32>
    %292 = tpu.reciprocal %291 : vector<8x1xf32> -> vector<8x1xf32>
    %293 = arith.mulf %290, %292 : vector<8x1xf32>
    %294 = vector.broadcast %293 : vector<8x1xf32> to vector<8x2xf32>
    %295 = arith.mulf %294, %284 : vector<8x2xf32>
    %296 = arith.mulf %295, %21 : vector<8x2xf32>
    %297 = arith.subf %296, %281 : vector<8x2xf32>
    %298 = vector.broadcast %249 : f32 to vector<8x2xf32>
    %299 = arith.mulf %298, %297 : vector<8x2xf32>
    %300 = arith.addf %243, %299 : vector<8x2xf32>
    %301 = arith.mulf %16, %300 : vector<8x2xf32>
    %302 = arith.mulf %300, %300 : vector<8x2xf32>
    %cst_69 = arith.constant 1.000000e+00 : f32
    %303 = vector.broadcast %cst_69 : f32 to vector<8x2xf32>
    %304 = arith.subf %302, %303 : vector<8x2xf32>
    %305 = arith.mulf %301, %304 : vector<8x2xf32>
    %c7_i32_70 = arith.constant 7 : i32
    %306 = tpu.dynamic_rotate %300 by %c7_i32_70 dim 0 : vector<8x2xf32>, i32 -> vector<8x2xf32>
    %c1_i32_71 = arith.constant 1 : i32
    %307 = tpu.dynamic_rotate %300 by %c1_i32_71 dim 0 : vector<8x2xf32>, i32 -> vector<8x2xf32>
    %308 = arith.subf %306, %307 : vector<8x2xf32>
    %309 = arith.mulf %308, %308 : vector<8x2xf32>
    %cst_72 = arith.constant dense<0.000000e+00> : vector<8xf32>
    %310 = vector.multi_reduction <add>, %309, %cst_72 [1] : vector<8x2xf32> to vector<8xf32>
    %311 = vector.shape_cast %310 : vector<8xf32> to vector<8x1xf32>
    %312 = arith.mulf %305, %308 : vector<8x2xf32>
    %cst_73 = arith.constant dense<0.000000e+00> : vector<8xf32>
    %313 = vector.multi_reduction <add>, %312, %cst_73 [1] : vector<8x2xf32> to vector<8xf32>
    %314 = vector.shape_cast %313 : vector<8xf32> to vector<8x1xf32>
    %315 = arith.maximumf %311, %22 : vector<8x1xf32>
    %316 = tpu.reciprocal %315 : vector<8x1xf32> -> vector<8x1xf32>
    %317 = arith.mulf %314, %316 : vector<8x1xf32>
    %318 = vector.broadcast %317 : vector<8x1xf32> to vector<8x2xf32>
    %319 = arith.mulf %318, %308 : vector<8x2xf32>
    %320 = arith.mulf %319, %21 : vector<8x2xf32>
    %321 = arith.subf %320, %305 : vector<8x2xf32>
    %322 = vector.broadcast %246 : f32 to vector<8x2xf32>
    %323 = arith.mulf %322, %321 : vector<8x2xf32>
    %324 = arith.addf %243, %323 : vector<8x2xf32>
    %325 = arith.mulf %16, %324 : vector<8x2xf32>
    %326 = arith.mulf %324, %324 : vector<8x2xf32>
    %cst_74 = arith.constant 1.000000e+00 : f32
    %327 = vector.broadcast %cst_74 : f32 to vector<8x2xf32>
    %328 = arith.subf %326, %327 : vector<8x2xf32>
    %329 = arith.mulf %325, %328 : vector<8x2xf32>
    %c7_i32_75 = arith.constant 7 : i32
    %330 = tpu.dynamic_rotate %324 by %c7_i32_75 dim 0 : vector<8x2xf32>, i32 -> vector<8x2xf32>
    %c1_i32_76 = arith.constant 1 : i32
    %331 = tpu.dynamic_rotate %324 by %c1_i32_76 dim 0 : vector<8x2xf32>, i32 -> vector<8x2xf32>
    %332 = arith.subf %330, %331 : vector<8x2xf32>
    %333 = arith.mulf %332, %332 : vector<8x2xf32>
    %cst_77 = arith.constant dense<0.000000e+00> : vector<8xf32>
    %334 = vector.multi_reduction <add>, %333, %cst_77 [1] : vector<8x2xf32> to vector<8xf32>
    %335 = vector.shape_cast %334 : vector<8xf32> to vector<8x1xf32>
    %336 = arith.mulf %329, %332 : vector<8x2xf32>
    %cst_78 = arith.constant dense<0.000000e+00> : vector<8xf32>
    %337 = vector.multi_reduction <add>, %336, %cst_78 [1] : vector<8x2xf32> to vector<8xf32>
    %338 = vector.shape_cast %337 : vector<8xf32> to vector<8x1xf32>
    %339 = arith.maximumf %335, %22 : vector<8x1xf32>
    %340 = tpu.reciprocal %339 : vector<8x1xf32> -> vector<8x1xf32>
    %341 = arith.mulf %338, %340 : vector<8x1xf32>
    %342 = vector.broadcast %341 : vector<8x1xf32> to vector<8x2xf32>
    %343 = arith.mulf %342, %332 : vector<8x2xf32>
    %344 = arith.mulf %343, %21 : vector<8x2xf32>
    %345 = arith.subf %344, %329 : vector<8x2xf32>
    %346 = arith.addf %297, %321 : vector<8x2xf32>
    %cst_79 = arith.constant 2.000000e+00 : f32
    %347 = vector.broadcast %cst_79 : f32 to vector<8x2xf32>
    %348 = arith.mulf %347, %346 : vector<8x2xf32>
    %349 = arith.addf %273, %348 : vector<8x2xf32>
    %350 = arith.addf %349, %345 : vector<8x2xf32>
    %351 = vector.broadcast %252 : f32 to vector<8x2xf32>
    %352 = arith.mulf %351, %350 : vector<8x2xf32>
    %353 = arith.addf %243, %352 : vector<8x2xf32>
    %c3_i32_80 = arith.constant 3 : i32
    %c3_i32_81 = arith.constant 3 : i32
    %354 = arith.muli %c3_i32_81, %c3_i32_80 : i32
    %355 = arith.index_cast %354 : i32 to index
    %356 = memref.load %arg0[%355] : memref<24xf32, #tpu.memory_space<smem>>
    %c1_i32_82 = arith.constant 1 : i32
    %357 = arith.addi %354, %c1_i32_82 : i32
    %358 = arith.index_cast %357 : i32 to index
    %359 = memref.load %arg0[%358] : memref<24xf32, #tpu.memory_space<smem>>
    %c2_i32_83 = arith.constant 2 : i32
    %360 = arith.addi %354, %c2_i32_83 : i32
    %361 = arith.index_cast %360 : i32 to index
    %362 = memref.load %arg0[%361] : memref<24xf32, #tpu.memory_space<smem>>
    %363 = arith.mulf %16, %353 : vector<8x2xf32>
    %364 = arith.mulf %353, %353 : vector<8x2xf32>
    %cst_84 = arith.constant 1.000000e+00 : f32
    %365 = vector.broadcast %cst_84 : f32 to vector<8x2xf32>
    %366 = arith.subf %364, %365 : vector<8x2xf32>
    %367 = arith.mulf %363, %366 : vector<8x2xf32>
    %c7_i32_85 = arith.constant 7 : i32
    %368 = tpu.dynamic_rotate %353 by %c7_i32_85 dim 0 : vector<8x2xf32>, i32 -> vector<8x2xf32>
    %c1_i32_86 = arith.constant 1 : i32
    %369 = tpu.dynamic_rotate %353 by %c1_i32_86 dim 0 : vector<8x2xf32>, i32 -> vector<8x2xf32>
    %370 = arith.subf %368, %369 : vector<8x2xf32>
    %371 = arith.mulf %370, %370 : vector<8x2xf32>
    %cst_87 = arith.constant dense<0.000000e+00> : vector<8xf32>
    %372 = vector.multi_reduction <add>, %371, %cst_87 [1] : vector<8x2xf32> to vector<8xf32>
    %373 = vector.shape_cast %372 : vector<8xf32> to vector<8x1xf32>
    %374 = arith.mulf %367, %370 : vector<8x2xf32>
    %cst_88 = arith.constant dense<0.000000e+00> : vector<8xf32>
    %375 = vector.multi_reduction <add>, %374, %cst_88 [1] : vector<8x2xf32> to vector<8xf32>
    %376 = vector.shape_cast %375 : vector<8xf32> to vector<8x1xf32>
    %377 = arith.maximumf %373, %22 : vector<8x1xf32>
    %378 = tpu.reciprocal %377 : vector<8x1xf32> -> vector<8x1xf32>
    %379 = arith.mulf %376, %378 : vector<8x1xf32>
    %380 = vector.broadcast %379 : vector<8x1xf32> to vector<8x2xf32>
    %381 = arith.mulf %380, %370 : vector<8x2xf32>
    %382 = arith.mulf %381, %21 : vector<8x2xf32>
    %383 = arith.subf %382, %367 : vector<8x2xf32>
    %384 = vector.broadcast %359 : f32 to vector<8x2xf32>
    %385 = arith.mulf %384, %383 : vector<8x2xf32>
    %386 = arith.addf %353, %385 : vector<8x2xf32>
    %387 = arith.mulf %16, %386 : vector<8x2xf32>
    %388 = arith.mulf %386, %386 : vector<8x2xf32>
    %cst_89 = arith.constant 1.000000e+00 : f32
    %389 = vector.broadcast %cst_89 : f32 to vector<8x2xf32>
    %390 = arith.subf %388, %389 : vector<8x2xf32>
    %391 = arith.mulf %387, %390 : vector<8x2xf32>
    %c7_i32_90 = arith.constant 7 : i32
    %392 = tpu.dynamic_rotate %386 by %c7_i32_90 dim 0 : vector<8x2xf32>, i32 -> vector<8x2xf32>
    %c1_i32_91 = arith.constant 1 : i32
    %393 = tpu.dynamic_rotate %386 by %c1_i32_91 dim 0 : vector<8x2xf32>, i32 -> vector<8x2xf32>
    %394 = arith.subf %392, %393 : vector<8x2xf32>
    %395 = arith.mulf %394, %394 : vector<8x2xf32>
    %cst_92 = arith.constant dense<0.000000e+00> : vector<8xf32>
    %396 = vector.multi_reduction <add>, %395, %cst_92 [1] : vector<8x2xf32> to vector<8xf32>
    %397 = vector.shape_cast %396 : vector<8xf32> to vector<8x1xf32>
    %398 = arith.mulf %391, %394 : vector<8x2xf32>
    %cst_93 = arith.constant dense<0.000000e+00> : vector<8xf32>
    %399 = vector.multi_reduction <add>, %398, %cst_93 [1] : vector<8x2xf32> to vector<8xf32>
    %400 = vector.shape_cast %399 : vector<8xf32> to vector<8x1xf32>
    %401 = arith.maximumf %397, %22 : vector<8x1xf32>
    %402 = tpu.reciprocal %401 : vector<8x1xf32> -> vector<8x1xf32>
    %403 = arith.mulf %400, %402 : vector<8x1xf32>
    %404 = vector.broadcast %403 : vector<8x1xf32> to vector<8x2xf32>
    %405 = arith.mulf %404, %394 : vector<8x2xf32>
    %406 = arith.mulf %405, %21 : vector<8x2xf32>
    %407 = arith.subf %406, %391 : vector<8x2xf32>
    %408 = vector.broadcast %359 : f32 to vector<8x2xf32>
    %409 = arith.mulf %408, %407 : vector<8x2xf32>
    %410 = arith.addf %353, %409 : vector<8x2xf32>
    %411 = arith.mulf %16, %410 : vector<8x2xf32>
    %412 = arith.mulf %410, %410 : vector<8x2xf32>
    %cst_94 = arith.constant 1.000000e+00 : f32
    %413 = vector.broadcast %cst_94 : f32 to vector<8x2xf32>
    %414 = arith.subf %412, %413 : vector<8x2xf32>
    %415 = arith.mulf %411, %414 : vector<8x2xf32>
    %c7_i32_95 = arith.constant 7 : i32
    %416 = tpu.dynamic_rotate %410 by %c7_i32_95 dim 0 : vector<8x2xf32>, i32 -> vector<8x2xf32>
    %c1_i32_96 = arith.constant 1 : i32
    %417 = tpu.dynamic_rotate %410 by %c1_i32_96 dim 0 : vector<8x2xf32>, i32 -> vector<8x2xf32>
    %418 = arith.subf %416, %417 : vector<8x2xf32>
    %419 = arith.mulf %418, %418 : vector<8x2xf32>
    %cst_97 = arith.constant dense<0.000000e+00> : vector<8xf32>
    %420 = vector.multi_reduction <add>, %419, %cst_97 [1] : vector<8x2xf32> to vector<8xf32>
    %421 = vector.shape_cast %420 : vector<8xf32> to vector<8x1xf32>
    %422 = arith.mulf %415, %418 : vector<8x2xf32>
    %cst_98 = arith.constant dense<0.000000e+00> : vector<8xf32>
    %423 = vector.multi_reduction <add>, %422, %cst_98 [1] : vector<8x2xf32> to vector<8xf32>
    %424 = vector.shape_cast %423 : vector<8xf32> to vector<8x1xf32>
    %425 = arith.maximumf %421, %22 : vector<8x1xf32>
    %426 = tpu.reciprocal %425 : vector<8x1xf32> -> vector<8x1xf32>
    %427 = arith.mulf %424, %426 : vector<8x1xf32>
    %428 = vector.broadcast %427 : vector<8x1xf32> to vector<8x2xf32>
    %429 = arith.mulf %428, %418 : vector<8x2xf32>
    %430 = arith.mulf %429, %21 : vector<8x2xf32>
    %431 = arith.subf %430, %415 : vector<8x2xf32>
    %432 = vector.broadcast %356 : f32 to vector<8x2xf32>
    %433 = arith.mulf %432, %431 : vector<8x2xf32>
    %434 = arith.addf %353, %433 : vector<8x2xf32>
    %435 = arith.mulf %16, %434 : vector<8x2xf32>
    %436 = arith.mulf %434, %434 : vector<8x2xf32>
    %cst_99 = arith.constant 1.000000e+00 : f32
    %437 = vector.broadcast %cst_99 : f32 to vector<8x2xf32>
    %438 = arith.subf %436, %437 : vector<8x2xf32>
    %439 = arith.mulf %435, %438 : vector<8x2xf32>
    %c7_i32_100 = arith.constant 7 : i32
    %440 = tpu.dynamic_rotate %434 by %c7_i32_100 dim 0 : vector<8x2xf32>, i32 -> vector<8x2xf32>
    %c1_i32_101 = arith.constant 1 : i32
    %441 = tpu.dynamic_rotate %434 by %c1_i32_101 dim 0 : vector<8x2xf32>, i32 -> vector<8x2xf32>
    %442 = arith.subf %440, %441 : vector<8x2xf32>
    %443 = arith.mulf %442, %442 : vector<8x2xf32>
    %cst_102 = arith.constant dense<0.000000e+00> : vector<8xf32>
    %444 = vector.multi_reduction <add>, %443, %cst_102 [1] : vector<8x2xf32> to vector<8xf32>
    %445 = vector.shape_cast %444 : vector<8xf32> to vector<8x1xf32>
    %446 = arith.mulf %439, %442 : vector<8x2xf32>
    %cst_103 = arith.constant dense<0.000000e+00> : vector<8xf32>
    %447 = vector.multi_reduction <add>, %446, %cst_103 [1] : vector<8x2xf32> to vector<8xf32>
    %448 = vector.shape_cast %447 : vector<8xf32> to vector<8x1xf32>
    %449 = arith.maximumf %445, %22 : vector<8x1xf32>
    %450 = tpu.reciprocal %449 : vector<8x1xf32> -> vector<8x1xf32>
    %451 = arith.mulf %448, %450 : vector<8x1xf32>
    %452 = vector.broadcast %451 : vector<8x1xf32> to vector<8x2xf32>
    %453 = arith.mulf %452, %442 : vector<8x2xf32>
    %454 = arith.mulf %453, %21 : vector<8x2xf32>
    %455 = arith.subf %454, %439 : vector<8x2xf32>
    %456 = arith.addf %407, %431 : vector<8x2xf32>
    %cst_104 = arith.constant 2.000000e+00 : f32
    %457 = vector.broadcast %cst_104 : f32 to vector<8x2xf32>
    %458 = arith.mulf %457, %456 : vector<8x2xf32>
    %459 = arith.addf %383, %458 : vector<8x2xf32>
    %460 = arith.addf %459, %455 : vector<8x2xf32>
    %461 = vector.broadcast %362 : f32 to vector<8x2xf32>
    %462 = arith.mulf %461, %460 : vector<8x2xf32>
    %463 = arith.addf %353, %462 : vector<8x2xf32>
    %c4_i32 = arith.constant 4 : i32
    %c3_i32_105 = arith.constant 3 : i32
    %464 = arith.muli %c3_i32_105, %c4_i32 : i32
    %465 = arith.index_cast %464 : i32 to index
    %466 = memref.load %arg0[%465] : memref<24xf32, #tpu.memory_space<smem>>
    %c1_i32_106 = arith.constant 1 : i32
    %467 = arith.addi %464, %c1_i32_106 : i32
    %468 = arith.index_cast %467 : i32 to index
    %469 = memref.load %arg0[%468] : memref<24xf32, #tpu.memory_space<smem>>
    %c2_i32_107 = arith.constant 2 : i32
    %470 = arith.addi %464, %c2_i32_107 : i32
    %471 = arith.index_cast %470 : i32 to index
    %472 = memref.load %arg0[%471] : memref<24xf32, #tpu.memory_space<smem>>
    %473 = arith.mulf %16, %463 : vector<8x2xf32>
    %474 = arith.mulf %463, %463 : vector<8x2xf32>
    %cst_108 = arith.constant 1.000000e+00 : f32
    %475 = vector.broadcast %cst_108 : f32 to vector<8x2xf32>
    %476 = arith.subf %474, %475 : vector<8x2xf32>
    %477 = arith.mulf %473, %476 : vector<8x2xf32>
    %c7_i32_109 = arith.constant 7 : i32
    %478 = tpu.dynamic_rotate %463 by %c7_i32_109 dim 0 : vector<8x2xf32>, i32 -> vector<8x2xf32>
    %c1_i32_110 = arith.constant 1 : i32
    %479 = tpu.dynamic_rotate %463 by %c1_i32_110 dim 0 : vector<8x2xf32>, i32 -> vector<8x2xf32>
    %480 = arith.subf %478, %479 : vector<8x2xf32>
    %481 = arith.mulf %480, %480 : vector<8x2xf32>
    %cst_111 = arith.constant dense<0.000000e+00> : vector<8xf32>
    %482 = vector.multi_reduction <add>, %481, %cst_111 [1] : vector<8x2xf32> to vector<8xf32>
    %483 = vector.shape_cast %482 : vector<8xf32> to vector<8x1xf32>
    %484 = arith.mulf %477, %480 : vector<8x2xf32>
    %cst_112 = arith.constant dense<0.000000e+00> : vector<8xf32>
    %485 = vector.multi_reduction <add>, %484, %cst_112 [1] : vector<8x2xf32> to vector<8xf32>
    %486 = vector.shape_cast %485 : vector<8xf32> to vector<8x1xf32>
    %487 = arith.maximumf %483, %22 : vector<8x1xf32>
    %488 = tpu.reciprocal %487 : vector<8x1xf32> -> vector<8x1xf32>
    %489 = arith.mulf %486, %488 : vector<8x1xf32>
    %490 = vector.broadcast %489 : vector<8x1xf32> to vector<8x2xf32>
    %491 = arith.mulf %490, %480 : vector<8x2xf32>
    %492 = arith.mulf %491, %21 : vector<8x2xf32>
    %493 = arith.subf %492, %477 : vector<8x2xf32>
    %494 = vector.broadcast %469 : f32 to vector<8x2xf32>
    %495 = arith.mulf %494, %493 : vector<8x2xf32>
    %496 = arith.addf %463, %495 : vector<8x2xf32>
    %497 = arith.mulf %16, %496 : vector<8x2xf32>
    %498 = arith.mulf %496, %496 : vector<8x2xf32>
    %cst_113 = arith.constant 1.000000e+00 : f32
    %499 = vector.broadcast %cst_113 : f32 to vector<8x2xf32>
    %500 = arith.subf %498, %499 : vector<8x2xf32>
    %501 = arith.mulf %497, %500 : vector<8x2xf32>
    %c7_i32_114 = arith.constant 7 : i32
    %502 = tpu.dynamic_rotate %496 by %c7_i32_114 dim 0 : vector<8x2xf32>, i32 -> vector<8x2xf32>
    %c1_i32_115 = arith.constant 1 : i32
    %503 = tpu.dynamic_rotate %496 by %c1_i32_115 dim 0 : vector<8x2xf32>, i32 -> vector<8x2xf32>
    %504 = arith.subf %502, %503 : vector<8x2xf32>
    %505 = arith.mulf %504, %504 : vector<8x2xf32>
    %cst_116 = arith.constant dense<0.000000e+00> : vector<8xf32>
    %506 = vector.multi_reduction <add>, %505, %cst_116 [1] : vector<8x2xf32> to vector<8xf32>
    %507 = vector.shape_cast %506 : vector<8xf32> to vector<8x1xf32>
    %508 = arith.mulf %501, %504 : vector<8x2xf32>
    %cst_117 = arith.constant dense<0.000000e+00> : vector<8xf32>
    %509 = vector.multi_reduction <add>, %508, %cst_117 [1] : vector<8x2xf32> to vector<8xf32>
    %510 = vector.shape_cast %509 : vector<8xf32> to vector<8x1xf32>
    %511 = arith.maximumf %507, %22 : vector<8x1xf32>
    %512 = tpu.reciprocal %511 : vector<8x1xf32> -> vector<8x1xf32>
    %513 = arith.mulf %510, %512 : vector<8x1xf32>
    %514 = vector.broadcast %513 : vector<8x1xf32> to vector<8x2xf32>
    %515 = arith.mulf %514, %504 : vector<8x2xf32>
    %516 = arith.mulf %515, %21 : vector<8x2xf32>
    %517 = arith.subf %516, %501 : vector<8x2xf32>
    %518 = vector.broadcast %469 : f32 to vector<8x2xf32>
    %519 = arith.mulf %518, %517 : vector<8x2xf32>
    %520 = arith.addf %463, %519 : vector<8x2xf32>
    %521 = arith.mulf %16, %520 : vector<8x2xf32>
    %522 = arith.mulf %520, %520 : vector<8x2xf32>
    %cst_118 = arith.constant 1.000000e+00 : f32
    %523 = vector.broadcast %cst_118 : f32 to vector<8x2xf32>
    %524 = arith.subf %522, %523 : vector<8x2xf32>
    %525 = arith.mulf %521, %524 : vector<8x2xf32>
    %c7_i32_119 = arith.constant 7 : i32
    %526 = tpu.dynamic_rotate %520 by %c7_i32_119 dim 0 : vector<8x2xf32>, i32 -> vector<8x2xf32>
    %c1_i32_120 = arith.constant 1 : i32
    %527 = tpu.dynamic_rotate %520 by %c1_i32_120 dim 0 : vector<8x2xf32>, i32 -> vector<8x2xf32>
    %528 = arith.subf %526, %527 : vector<8x2xf32>
    %529 = arith.mulf %528, %528 : vector<8x2xf32>
    %cst_121 = arith.constant dense<0.000000e+00> : vector<8xf32>
    %530 = vector.multi_reduction <add>, %529, %cst_121 [1] : vector<8x2xf32> to vector<8xf32>
    %531 = vector.shape_cast %530 : vector<8xf32> to vector<8x1xf32>
    %532 = arith.mulf %525, %528 : vector<8x2xf32>
    %cst_122 = arith.constant dense<0.000000e+00> : vector<8xf32>
    %533 = vector.multi_reduction <add>, %532, %cst_122 [1] : vector<8x2xf32> to vector<8xf32>
    %534 = vector.shape_cast %533 : vector<8xf32> to vector<8x1xf32>
    %535 = arith.maximumf %531, %22 : vector<8x1xf32>
    %536 = tpu.reciprocal %535 : vector<8x1xf32> -> vector<8x1xf32>
    %537 = arith.mulf %534, %536 : vector<8x1xf32>
    %538 = vector.broadcast %537 : vector<8x1xf32> to vector<8x2xf32>
    %539 = arith.mulf %538, %528 : vector<8x2xf32>
    %540 = arith.mulf %539, %21 : vector<8x2xf32>
    %541 = arith.subf %540, %525 : vector<8x2xf32>
    %542 = vector.broadcast %466 : f32 to vector<8x2xf32>
    %543 = arith.mulf %542, %541 : vector<8x2xf32>
    %544 = arith.addf %463, %543 : vector<8x2xf32>
    %545 = arith.mulf %16, %544 : vector<8x2xf32>
    %546 = arith.mulf %544, %544 : vector<8x2xf32>
    %cst_123 = arith.constant 1.000000e+00 : f32
    %547 = vector.broadcast %cst_123 : f32 to vector<8x2xf32>
    %548 = arith.subf %546, %547 : vector<8x2xf32>
    %549 = arith.mulf %545, %548 : vector<8x2xf32>
    %c7_i32_124 = arith.constant 7 : i32
    %550 = tpu.dynamic_rotate %544 by %c7_i32_124 dim 0 : vector<8x2xf32>, i32 -> vector<8x2xf32>
    %c1_i32_125 = arith.constant 1 : i32
    %551 = tpu.dynamic_rotate %544 by %c1_i32_125 dim 0 : vector<8x2xf32>, i32 -> vector<8x2xf32>
    %552 = arith.subf %550, %551 : vector<8x2xf32>
    %553 = arith.mulf %552, %552 : vector<8x2xf32>
    %cst_126 = arith.constant dense<0.000000e+00> : vector<8xf32>
    %554 = vector.multi_reduction <add>, %553, %cst_126 [1] : vector<8x2xf32> to vector<8xf32>
    %555 = vector.shape_cast %554 : vector<8xf32> to vector<8x1xf32>
    %556 = arith.mulf %549, %552 : vector<8x2xf32>
    %cst_127 = arith.constant dense<0.000000e+00> : vector<8xf32>
    %557 = vector.multi_reduction <add>, %556, %cst_127 [1] : vector<8x2xf32> to vector<8xf32>
    %558 = vector.shape_cast %557 : vector<8xf32> to vector<8x1xf32>
    %559 = arith.maximumf %555, %22 : vector<8x1xf32>
    %560 = tpu.reciprocal %559 : vector<8x1xf32> -> vector<8x1xf32>
    %561 = arith.mulf %558, %560 : vector<8x1xf32>
    %562 = vector.broadcast %561 : vector<8x1xf32> to vector<8x2xf32>
    %563 = arith.mulf %562, %552 : vector<8x2xf32>
    %564 = arith.mulf %563, %21 : vector<8x2xf32>
    %565 = arith.subf %564, %549 : vector<8x2xf32>
    %566 = arith.addf %517, %541 : vector<8x2xf32>
    %cst_128 = arith.constant 2.000000e+00 : f32
    %567 = vector.broadcast %cst_128 : f32 to vector<8x2xf32>
    %568 = arith.mulf %567, %566 : vector<8x2xf32>
    %569 = arith.addf %493, %568 : vector<8x2xf32>
    %570 = arith.addf %569, %565 : vector<8x2xf32>
    %571 = vector.broadcast %472 : f32 to vector<8x2xf32>
    %572 = arith.mulf %571, %570 : vector<8x2xf32>
    %573 = arith.addf %463, %572 : vector<8x2xf32>
    %c5_i32 = arith.constant 5 : i32
    %c3_i32_129 = arith.constant 3 : i32
    %574 = arith.muli %c3_i32_129, %c5_i32 : i32
    %575 = arith.index_cast %574 : i32 to index
    %576 = memref.load %arg0[%575] : memref<24xf32, #tpu.memory_space<smem>>
    %c1_i32_130 = arith.constant 1 : i32
    %577 = arith.addi %574, %c1_i32_130 : i32
    %578 = arith.index_cast %577 : i32 to index
    %579 = memref.load %arg0[%578] : memref<24xf32, #tpu.memory_space<smem>>
    %c2_i32_131 = arith.constant 2 : i32
    %580 = arith.addi %574, %c2_i32_131 : i32
    %581 = arith.index_cast %580 : i32 to index
    %582 = memref.load %arg0[%581] : memref<24xf32, #tpu.memory_space<smem>>
    %583 = arith.mulf %16, %573 : vector<8x2xf32>
    %584 = arith.mulf %573, %573 : vector<8x2xf32>
    %cst_132 = arith.constant 1.000000e+00 : f32
    %585 = vector.broadcast %cst_132 : f32 to vector<8x2xf32>
    %586 = arith.subf %584, %585 : vector<8x2xf32>
    %587 = arith.mulf %583, %586 : vector<8x2xf32>
    %c7_i32_133 = arith.constant 7 : i32
    %588 = tpu.dynamic_rotate %573 by %c7_i32_133 dim 0 : vector<8x2xf32>, i32 -> vector<8x2xf32>
    %c1_i32_134 = arith.constant 1 : i32
    %589 = tpu.dynamic_rotate %573 by %c1_i32_134 dim 0 : vector<8x2xf32>, i32 -> vector<8x2xf32>
    %590 = arith.subf %588, %589 : vector<8x2xf32>
    %591 = arith.mulf %590, %590 : vector<8x2xf32>
    %cst_135 = arith.constant dense<0.000000e+00> : vector<8xf32>
    %592 = vector.multi_reduction <add>, %591, %cst_135 [1] : vector<8x2xf32> to vector<8xf32>
    %593 = vector.shape_cast %592 : vector<8xf32> to vector<8x1xf32>
    %594 = arith.mulf %587, %590 : vector<8x2xf32>
    %cst_136 = arith.constant dense<0.000000e+00> : vector<8xf32>
    %595 = vector.multi_reduction <add>, %594, %cst_136 [1] : vector<8x2xf32> to vector<8xf32>
    %596 = vector.shape_cast %595 : vector<8xf32> to vector<8x1xf32>
    %597 = arith.maximumf %593, %22 : vector<8x1xf32>
    %598 = tpu.reciprocal %597 : vector<8x1xf32> -> vector<8x1xf32>
    %599 = arith.mulf %596, %598 : vector<8x1xf32>
    %600 = vector.broadcast %599 : vector<8x1xf32> to vector<8x2xf32>
    %601 = arith.mulf %600, %590 : vector<8x2xf32>
    %602 = arith.mulf %601, %21 : vector<8x2xf32>
    %603 = arith.subf %602, %587 : vector<8x2xf32>
    %604 = vector.broadcast %579 : f32 to vector<8x2xf32>
    %605 = arith.mulf %604, %603 : vector<8x2xf32>
    %606 = arith.addf %573, %605 : vector<8x2xf32>
    %607 = arith.mulf %16, %606 : vector<8x2xf32>
    %608 = arith.mulf %606, %606 : vector<8x2xf32>
    %cst_137 = arith.constant 1.000000e+00 : f32
    %609 = vector.broadcast %cst_137 : f32 to vector<8x2xf32>
    %610 = arith.subf %608, %609 : vector<8x2xf32>
    %611 = arith.mulf %607, %610 : vector<8x2xf32>
    %c7_i32_138 = arith.constant 7 : i32
    %612 = tpu.dynamic_rotate %606 by %c7_i32_138 dim 0 : vector<8x2xf32>, i32 -> vector<8x2xf32>
    %c1_i32_139 = arith.constant 1 : i32
    %613 = tpu.dynamic_rotate %606 by %c1_i32_139 dim 0 : vector<8x2xf32>, i32 -> vector<8x2xf32>
    %614 = arith.subf %612, %613 : vector<8x2xf32>
    %615 = arith.mulf %614, %614 : vector<8x2xf32>
    %cst_140 = arith.constant dense<0.000000e+00> : vector<8xf32>
    %616 = vector.multi_reduction <add>, %615, %cst_140 [1] : vector<8x2xf32> to vector<8xf32>
    %617 = vector.shape_cast %616 : vector<8xf32> to vector<8x1xf32>
    %618 = arith.mulf %611, %614 : vector<8x2xf32>
    %cst_141 = arith.constant dense<0.000000e+00> : vector<8xf32>
    %619 = vector.multi_reduction <add>, %618, %cst_141 [1] : vector<8x2xf32> to vector<8xf32>
    %620 = vector.shape_cast %619 : vector<8xf32> to vector<8x1xf32>
    %621 = arith.maximumf %617, %22 : vector<8x1xf32>
    %622 = tpu.reciprocal %621 : vector<8x1xf32> -> vector<8x1xf32>
    %623 = arith.mulf %620, %622 : vector<8x1xf32>
    %624 = vector.broadcast %623 : vector<8x1xf32> to vector<8x2xf32>
    %625 = arith.mulf %624, %614 : vector<8x2xf32>
    %626 = arith.mulf %625, %21 : vector<8x2xf32>
    %627 = arith.subf %626, %611 : vector<8x2xf32>
    %628 = vector.broadcast %579 : f32 to vector<8x2xf32>
    %629 = arith.mulf %628, %627 : vector<8x2xf32>
    %630 = arith.addf %573, %629 : vector<8x2xf32>
    %631 = arith.mulf %16, %630 : vector<8x2xf32>
    %632 = arith.mulf %630, %630 : vector<8x2xf32>
    %cst_142 = arith.constant 1.000000e+00 : f32
    %633 = vector.broadcast %cst_142 : f32 to vector<8x2xf32>
    %634 = arith.subf %632, %633 : vector<8x2xf32>
    %635 = arith.mulf %631, %634 : vector<8x2xf32>
    %c7_i32_143 = arith.constant 7 : i32
    %636 = tpu.dynamic_rotate %630 by %c7_i32_143 dim 0 : vector<8x2xf32>, i32 -> vector<8x2xf32>
    %c1_i32_144 = arith.constant 1 : i32
    %637 = tpu.dynamic_rotate %630 by %c1_i32_144 dim 0 : vector<8x2xf32>, i32 -> vector<8x2xf32>
    %638 = arith.subf %636, %637 : vector<8x2xf32>
    %639 = arith.mulf %638, %638 : vector<8x2xf32>
    %cst_145 = arith.constant dense<0.000000e+00> : vector<8xf32>
    %640 = vector.multi_reduction <add>, %639, %cst_145 [1] : vector<8x2xf32> to vector<8xf32>
    %641 = vector.shape_cast %640 : vector<8xf32> to vector<8x1xf32>
    %642 = arith.mulf %635, %638 : vector<8x2xf32>
    %cst_146 = arith.constant dense<0.000000e+00> : vector<8xf32>
    %643 = vector.multi_reduction <add>, %642, %cst_146 [1] : vector<8x2xf32> to vector<8xf32>
    %644 = vector.shape_cast %643 : vector<8xf32> to vector<8x1xf32>
    %645 = arith.maximumf %641, %22 : vector<8x1xf32>
    %646 = tpu.reciprocal %645 : vector<8x1xf32> -> vector<8x1xf32>
    %647 = arith.mulf %644, %646 : vector<8x1xf32>
    %648 = vector.broadcast %647 : vector<8x1xf32> to vector<8x2xf32>
    %649 = arith.mulf %648, %638 : vector<8x2xf32>
    %650 = arith.mulf %649, %21 : vector<8x2xf32>
    %651 = arith.subf %650, %635 : vector<8x2xf32>
    %652 = vector.broadcast %576 : f32 to vector<8x2xf32>
    %653 = arith.mulf %652, %651 : vector<8x2xf32>
    %654 = arith.addf %573, %653 : vector<8x2xf32>
    %655 = arith.mulf %16, %654 : vector<8x2xf32>
    %656 = arith.mulf %654, %654 : vector<8x2xf32>
    %cst_147 = arith.constant 1.000000e+00 : f32
    %657 = vector.broadcast %cst_147 : f32 to vector<8x2xf32>
    %658 = arith.subf %656, %657 : vector<8x2xf32>
    %659 = arith.mulf %655, %658 : vector<8x2xf32>
    %c7_i32_148 = arith.constant 7 : i32
    %660 = tpu.dynamic_rotate %654 by %c7_i32_148 dim 0 : vector<8x2xf32>, i32 -> vector<8x2xf32>
    %c1_i32_149 = arith.constant 1 : i32
    %661 = tpu.dynamic_rotate %654 by %c1_i32_149 dim 0 : vector<8x2xf32>, i32 -> vector<8x2xf32>
    %662 = arith.subf %660, %661 : vector<8x2xf32>
    %663 = arith.mulf %662, %662 : vector<8x2xf32>
    %cst_150 = arith.constant dense<0.000000e+00> : vector<8xf32>
    %664 = vector.multi_reduction <add>, %663, %cst_150 [1] : vector<8x2xf32> to vector<8xf32>
    %665 = vector.shape_cast %664 : vector<8xf32> to vector<8x1xf32>
    %666 = arith.mulf %659, %662 : vector<8x2xf32>
    %cst_151 = arith.constant dense<0.000000e+00> : vector<8xf32>
    %667 = vector.multi_reduction <add>, %666, %cst_151 [1] : vector<8x2xf32> to vector<8xf32>
    %668 = vector.shape_cast %667 : vector<8xf32> to vector<8x1xf32>
    %669 = arith.maximumf %665, %22 : vector<8x1xf32>
    %670 = tpu.reciprocal %669 : vector<8x1xf32> -> vector<8x1xf32>
    %671 = arith.mulf %668, %670 : vector<8x1xf32>
    %672 = vector.broadcast %671 : vector<8x1xf32> to vector<8x2xf32>
    %673 = arith.mulf %672, %662 : vector<8x2xf32>
    %674 = arith.mulf %673, %21 : vector<8x2xf32>
    %675 = arith.subf %674, %659 : vector<8x2xf32>
    %676 = arith.addf %627, %651 : vector<8x2xf32>
    %cst_152 = arith.constant 2.000000e+00 : f32
    %677 = vector.broadcast %cst_152 : f32 to vector<8x2xf32>
    %678 = arith.mulf %677, %676 : vector<8x2xf32>
    %679 = arith.addf %603, %678 : vector<8x2xf32>
    %680 = arith.addf %679, %675 : vector<8x2xf32>
    %681 = vector.broadcast %582 : f32 to vector<8x2xf32>
    %682 = arith.mulf %681, %680 : vector<8x2xf32>
    %683 = arith.addf %573, %682 : vector<8x2xf32>
    %c6_i32 = arith.constant 6 : i32
    %c3_i32_153 = arith.constant 3 : i32
    %684 = arith.muli %c3_i32_153, %c6_i32 : i32
    %685 = arith.index_cast %684 : i32 to index
    %686 = memref.load %arg0[%685] : memref<24xf32, #tpu.memory_space<smem>>
    %c1_i32_154 = arith.constant 1 : i32
    %687 = arith.addi %684, %c1_i32_154 : i32
    %688 = arith.index_cast %687 : i32 to index
    %689 = memref.load %arg0[%688] : memref<24xf32, #tpu.memory_space<smem>>
    %c2_i32_155 = arith.constant 2 : i32
    %690 = arith.addi %684, %c2_i32_155 : i32
    %691 = arith.index_cast %690 : i32 to index
    %692 = memref.load %arg0[%691] : memref<24xf32, #tpu.memory_space<smem>>
    %693 = arith.mulf %16, %683 : vector<8x2xf32>
    %694 = arith.mulf %683, %683 : vector<8x2xf32>
    %cst_156 = arith.constant 1.000000e+00 : f32
    %695 = vector.broadcast %cst_156 : f32 to vector<8x2xf32>
    %696 = arith.subf %694, %695 : vector<8x2xf32>
    %697 = arith.mulf %693, %696 : vector<8x2xf32>
    %c7_i32_157 = arith.constant 7 : i32
    %698 = tpu.dynamic_rotate %683 by %c7_i32_157 dim 0 : vector<8x2xf32>, i32 -> vector<8x2xf32>
    %c1_i32_158 = arith.constant 1 : i32
    %699 = tpu.dynamic_rotate %683 by %c1_i32_158 dim 0 : vector<8x2xf32>, i32 -> vector<8x2xf32>
    %700 = arith.subf %698, %699 : vector<8x2xf32>
    %701 = arith.mulf %700, %700 : vector<8x2xf32>
    %cst_159 = arith.constant dense<0.000000e+00> : vector<8xf32>
    %702 = vector.multi_reduction <add>, %701, %cst_159 [1] : vector<8x2xf32> to vector<8xf32>
    %703 = vector.shape_cast %702 : vector<8xf32> to vector<8x1xf32>
    %704 = arith.mulf %697, %700 : vector<8x2xf32>
    %cst_160 = arith.constant dense<0.000000e+00> : vector<8xf32>
    %705 = vector.multi_reduction <add>, %704, %cst_160 [1] : vector<8x2xf32> to vector<8xf32>
    %706 = vector.shape_cast %705 : vector<8xf32> to vector<8x1xf32>
    %707 = arith.maximumf %703, %22 : vector<8x1xf32>
    %708 = tpu.reciprocal %707 : vector<8x1xf32> -> vector<8x1xf32>
    %709 = arith.mulf %706, %708 : vector<8x1xf32>
    %710 = vector.broadcast %709 : vector<8x1xf32> to vector<8x2xf32>
    %711 = arith.mulf %710, %700 : vector<8x2xf32>
    %712 = arith.mulf %711, %21 : vector<8x2xf32>
    %713 = arith.subf %712, %697 : vector<8x2xf32>
    %714 = vector.broadcast %689 : f32 to vector<8x2xf32>
    %715 = arith.mulf %714, %713 : vector<8x2xf32>
    %716 = arith.addf %683, %715 : vector<8x2xf32>
    %717 = arith.mulf %16, %716 : vector<8x2xf32>
    %718 = arith.mulf %716, %716 : vector<8x2xf32>
    %cst_161 = arith.constant 1.000000e+00 : f32
    %719 = vector.broadcast %cst_161 : f32 to vector<8x2xf32>
    %720 = arith.subf %718, %719 : vector<8x2xf32>
    %721 = arith.mulf %717, %720 : vector<8x2xf32>
    %c7_i32_162 = arith.constant 7 : i32
    %722 = tpu.dynamic_rotate %716 by %c7_i32_162 dim 0 : vector<8x2xf32>, i32 -> vector<8x2xf32>
    %c1_i32_163 = arith.constant 1 : i32
    %723 = tpu.dynamic_rotate %716 by %c1_i32_163 dim 0 : vector<8x2xf32>, i32 -> vector<8x2xf32>
    %724 = arith.subf %722, %723 : vector<8x2xf32>
    %725 = arith.mulf %724, %724 : vector<8x2xf32>
    %cst_164 = arith.constant dense<0.000000e+00> : vector<8xf32>
    %726 = vector.multi_reduction <add>, %725, %cst_164 [1] : vector<8x2xf32> to vector<8xf32>
    %727 = vector.shape_cast %726 : vector<8xf32> to vector<8x1xf32>
    %728 = arith.mulf %721, %724 : vector<8x2xf32>
    %cst_165 = arith.constant dense<0.000000e+00> : vector<8xf32>
    %729 = vector.multi_reduction <add>, %728, %cst_165 [1] : vector<8x2xf32> to vector<8xf32>
    %730 = vector.shape_cast %729 : vector<8xf32> to vector<8x1xf32>
    %731 = arith.maximumf %727, %22 : vector<8x1xf32>
    %732 = tpu.reciprocal %731 : vector<8x1xf32> -> vector<8x1xf32>
    %733 = arith.mulf %730, %732 : vector<8x1xf32>
    %734 = vector.broadcast %733 : vector<8x1xf32> to vector<8x2xf32>
    %735 = arith.mulf %734, %724 : vector<8x2xf32>
    %736 = arith.mulf %735, %21 : vector<8x2xf32>
    %737 = arith.subf %736, %721 : vector<8x2xf32>
    %738 = vector.broadcast %689 : f32 to vector<8x2xf32>
    %739 = arith.mulf %738, %737 : vector<8x2xf32>
    %740 = arith.addf %683, %739 : vector<8x2xf32>
    %741 = arith.mulf %16, %740 : vector<8x2xf32>
    %742 = arith.mulf %740, %740 : vector<8x2xf32>
    %cst_166 = arith.constant 1.000000e+00 : f32
    %743 = vector.broadcast %cst_166 : f32 to vector<8x2xf32>
    %744 = arith.subf %742, %743 : vector<8x2xf32>
    %745 = arith.mulf %741, %744 : vector<8x2xf32>
    %c7_i32_167 = arith.constant 7 : i32
    %746 = tpu.dynamic_rotate %740 by %c7_i32_167 dim 0 : vector<8x2xf32>, i32 -> vector<8x2xf32>
    %c1_i32_168 = arith.constant 1 : i32
    %747 = tpu.dynamic_rotate %740 by %c1_i32_168 dim 0 : vector<8x2xf32>, i32 -> vector<8x2xf32>
    %748 = arith.subf %746, %747 : vector<8x2xf32>
    %749 = arith.mulf %748, %748 : vector<8x2xf32>
    %cst_169 = arith.constant dense<0.000000e+00> : vector<8xf32>
    %750 = vector.multi_reduction <add>, %749, %cst_169 [1] : vector<8x2xf32> to vector<8xf32>
    %751 = vector.shape_cast %750 : vector<8xf32> to vector<8x1xf32>
    %752 = arith.mulf %745, %748 : vector<8x2xf32>
    %cst_170 = arith.constant dense<0.000000e+00> : vector<8xf32>
    %753 = vector.multi_reduction <add>, %752, %cst_170 [1] : vector<8x2xf32> to vector<8xf32>
    %754 = vector.shape_cast %753 : vector<8xf32> to vector<8x1xf32>
    %755 = arith.maximumf %751, %22 : vector<8x1xf32>
    %756 = tpu.reciprocal %755 : vector<8x1xf32> -> vector<8x1xf32>
    %757 = arith.mulf %754, %756 : vector<8x1xf32>
    %758 = vector.broadcast %757 : vector<8x1xf32> to vector<8x2xf32>
    %759 = arith.mulf %758, %748 : vector<8x2xf32>
    %760 = arith.mulf %759, %21 : vector<8x2xf32>
    %761 = arith.subf %760, %745 : vector<8x2xf32>
    %762 = vector.broadcast %686 : f32 to vector<8x2xf32>
    %763 = arith.mulf %762, %761 : vector<8x2xf32>
    %764 = arith.addf %683, %763 : vector<8x2xf32>
    %765 = arith.mulf %16, %764 : vector<8x2xf32>
    %766 = arith.mulf %764, %764 : vector<8x2xf32>
    %cst_171 = arith.constant 1.000000e+00 : f32
    %767 = vector.broadcast %cst_171 : f32 to vector<8x2xf32>
    %768 = arith.subf %766, %767 : vector<8x2xf32>
    %769 = arith.mulf %765, %768 : vector<8x2xf32>
    %c7_i32_172 = arith.constant 7 : i32
    %770 = tpu.dynamic_rotate %764 by %c7_i32_172 dim 0 : vector<8x2xf32>, i32 -> vector<8x2xf32>
    %c1_i32_173 = arith.constant 1 : i32
    %771 = tpu.dynamic_rotate %764 by %c1_i32_173 dim 0 : vector<8x2xf32>, i32 -> vector<8x2xf32>
    %772 = arith.subf %770, %771 : vector<8x2xf32>
    %773 = arith.mulf %772, %772 : vector<8x2xf32>
    %cst_174 = arith.constant dense<0.000000e+00> : vector<8xf32>
    %774 = vector.multi_reduction <add>, %773, %cst_174 [1] : vector<8x2xf32> to vector<8xf32>
    %775 = vector.shape_cast %774 : vector<8xf32> to vector<8x1xf32>
    %776 = arith.mulf %769, %772 : vector<8x2xf32>
    %cst_175 = arith.constant dense<0.000000e+00> : vector<8xf32>
    %777 = vector.multi_reduction <add>, %776, %cst_175 [1] : vector<8x2xf32> to vector<8xf32>
    %778 = vector.shape_cast %777 : vector<8xf32> to vector<8x1xf32>
    %779 = arith.maximumf %775, %22 : vector<8x1xf32>
    %780 = tpu.reciprocal %779 : vector<8x1xf32> -> vector<8x1xf32>
    %781 = arith.mulf %778, %780 : vector<8x1xf32>
    %782 = vector.broadcast %781 : vector<8x1xf32> to vector<8x2xf32>
    %783 = arith.mulf %782, %772 : vector<8x2xf32>
    %784 = arith.mulf %783, %21 : vector<8x2xf32>
    %785 = arith.subf %784, %769 : vector<8x2xf32>
    %786 = arith.addf %737, %761 : vector<8x2xf32>
    %cst_176 = arith.constant 2.000000e+00 : f32
    %787 = vector.broadcast %cst_176 : f32 to vector<8x2xf32>
    %788 = arith.mulf %787, %786 : vector<8x2xf32>
    %789 = arith.addf %713, %788 : vector<8x2xf32>
    %790 = arith.addf %789, %785 : vector<8x2xf32>
    %791 = vector.broadcast %692 : f32 to vector<8x2xf32>
    %792 = arith.mulf %791, %790 : vector<8x2xf32>
    %793 = arith.addf %683, %792 : vector<8x2xf32>
    %c7_i32_177 = arith.constant 7 : i32
    %c3_i32_178 = arith.constant 3 : i32
    %794 = arith.muli %c3_i32_178, %c7_i32_177 : i32
    %795 = arith.index_cast %794 : i32 to index
    %796 = memref.load %arg0[%795] : memref<24xf32, #tpu.memory_space<smem>>
    %c1_i32_179 = arith.constant 1 : i32
    %797 = arith.addi %794, %c1_i32_179 : i32
    %798 = arith.index_cast %797 : i32 to index
    %799 = memref.load %arg0[%798] : memref<24xf32, #tpu.memory_space<smem>>
    %c2_i32_180 = arith.constant 2 : i32
    %800 = arith.addi %794, %c2_i32_180 : i32
    %801 = arith.index_cast %800 : i32 to index
    %802 = memref.load %arg0[%801] : memref<24xf32, #tpu.memory_space<smem>>
    %803 = arith.mulf %16, %793 : vector<8x2xf32>
    %804 = arith.mulf %793, %793 : vector<8x2xf32>
    %cst_181 = arith.constant 1.000000e+00 : f32
    %805 = vector.broadcast %cst_181 : f32 to vector<8x2xf32>
    %806 = arith.subf %804, %805 : vector<8x2xf32>
    %807 = arith.mulf %803, %806 : vector<8x2xf32>
    %c7_i32_182 = arith.constant 7 : i32
    %808 = tpu.dynamic_rotate %793 by %c7_i32_182 dim 0 : vector<8x2xf32>, i32 -> vector<8x2xf32>
    %c1_i32_183 = arith.constant 1 : i32
    %809 = tpu.dynamic_rotate %793 by %c1_i32_183 dim 0 : vector<8x2xf32>, i32 -> vector<8x2xf32>
    %810 = arith.subf %808, %809 : vector<8x2xf32>
    %811 = arith.mulf %810, %810 : vector<8x2xf32>
    %cst_184 = arith.constant dense<0.000000e+00> : vector<8xf32>
    %812 = vector.multi_reduction <add>, %811, %cst_184 [1] : vector<8x2xf32> to vector<8xf32>
    %813 = vector.shape_cast %812 : vector<8xf32> to vector<8x1xf32>
    %814 = arith.mulf %807, %810 : vector<8x2xf32>
    %cst_185 = arith.constant dense<0.000000e+00> : vector<8xf32>
    %815 = vector.multi_reduction <add>, %814, %cst_185 [1] : vector<8x2xf32> to vector<8xf32>
    %816 = vector.shape_cast %815 : vector<8xf32> to vector<8x1xf32>
    %817 = arith.maximumf %813, %22 : vector<8x1xf32>
    %818 = tpu.reciprocal %817 : vector<8x1xf32> -> vector<8x1xf32>
    %819 = arith.mulf %816, %818 : vector<8x1xf32>
    %820 = vector.broadcast %819 : vector<8x1xf32> to vector<8x2xf32>
    %821 = arith.mulf %820, %810 : vector<8x2xf32>
    %822 = arith.mulf %821, %21 : vector<8x2xf32>
    %823 = arith.subf %822, %807 : vector<8x2xf32>
    %824 = vector.broadcast %799 : f32 to vector<8x2xf32>
    %825 = arith.mulf %824, %823 : vector<8x2xf32>
    %826 = arith.addf %793, %825 : vector<8x2xf32>
    %827 = arith.mulf %16, %826 : vector<8x2xf32>
    %828 = arith.mulf %826, %826 : vector<8x2xf32>
    %cst_186 = arith.constant 1.000000e+00 : f32
    %829 = vector.broadcast %cst_186 : f32 to vector<8x2xf32>
    %830 = arith.subf %828, %829 : vector<8x2xf32>
    %831 = arith.mulf %827, %830 : vector<8x2xf32>
    %c7_i32_187 = arith.constant 7 : i32
    %832 = tpu.dynamic_rotate %826 by %c7_i32_187 dim 0 : vector<8x2xf32>, i32 -> vector<8x2xf32>
    %c1_i32_188 = arith.constant 1 : i32
    %833 = tpu.dynamic_rotate %826 by %c1_i32_188 dim 0 : vector<8x2xf32>, i32 -> vector<8x2xf32>
    %834 = arith.subf %832, %833 : vector<8x2xf32>
    %835 = arith.mulf %834, %834 : vector<8x2xf32>
    %cst_189 = arith.constant dense<0.000000e+00> : vector<8xf32>
    %836 = vector.multi_reduction <add>, %835, %cst_189 [1] : vector<8x2xf32> to vector<8xf32>
    %837 = vector.shape_cast %836 : vector<8xf32> to vector<8x1xf32>
    %838 = arith.mulf %831, %834 : vector<8x2xf32>
    %cst_190 = arith.constant dense<0.000000e+00> : vector<8xf32>
    %839 = vector.multi_reduction <add>, %838, %cst_190 [1] : vector<8x2xf32> to vector<8xf32>
    %840 = vector.shape_cast %839 : vector<8xf32> to vector<8x1xf32>
    %841 = arith.maximumf %837, %22 : vector<8x1xf32>
    %842 = tpu.reciprocal %841 : vector<8x1xf32> -> vector<8x1xf32>
    %843 = arith.mulf %840, %842 : vector<8x1xf32>
    %844 = vector.broadcast %843 : vector<8x1xf32> to vector<8x2xf32>
    %845 = arith.mulf %844, %834 : vector<8x2xf32>
    %846 = arith.mulf %845, %21 : vector<8x2xf32>
    %847 = arith.subf %846, %831 : vector<8x2xf32>
    %848 = vector.broadcast %799 : f32 to vector<8x2xf32>
    %849 = arith.mulf %848, %847 : vector<8x2xf32>
    %850 = arith.addf %793, %849 : vector<8x2xf32>
    %851 = arith.mulf %16, %850 : vector<8x2xf32>
    %852 = arith.mulf %850, %850 : vector<8x2xf32>
    %cst_191 = arith.constant 1.000000e+00 : f32
    %853 = vector.broadcast %cst_191 : f32 to vector<8x2xf32>
    %854 = arith.subf %852, %853 : vector<8x2xf32>
    %855 = arith.mulf %851, %854 : vector<8x2xf32>
    %c7_i32_192 = arith.constant 7 : i32
    %856 = tpu.dynamic_rotate %850 by %c7_i32_192 dim 0 : vector<8x2xf32>, i32 -> vector<8x2xf32>
    %c1_i32_193 = arith.constant 1 : i32
    %857 = tpu.dynamic_rotate %850 by %c1_i32_193 dim 0 : vector<8x2xf32>, i32 -> vector<8x2xf32>
    %858 = arith.subf %856, %857 : vector<8x2xf32>
    %859 = arith.mulf %858, %858 : vector<8x2xf32>
    %cst_194 = arith.constant dense<0.000000e+00> : vector<8xf32>
    %860 = vector.multi_reduction <add>, %859, %cst_194 [1] : vector<8x2xf32> to vector<8xf32>
    %861 = vector.shape_cast %860 : vector<8xf32> to vector<8x1xf32>
    %862 = arith.mulf %855, %858 : vector<8x2xf32>
    %cst_195 = arith.constant dense<0.000000e+00> : vector<8xf32>
    %863 = vector.multi_reduction <add>, %862, %cst_195 [1] : vector<8x2xf32> to vector<8xf32>
    %864 = vector.shape_cast %863 : vector<8xf32> to vector<8x1xf32>
    %865 = arith.maximumf %861, %22 : vector<8x1xf32>
    %866 = tpu.reciprocal %865 : vector<8x1xf32> -> vector<8x1xf32>
    %867 = arith.mulf %864, %866 : vector<8x1xf32>
    %868 = vector.broadcast %867 : vector<8x1xf32> to vector<8x2xf32>
    %869 = arith.mulf %868, %858 : vector<8x2xf32>
    %870 = arith.mulf %869, %21 : vector<8x2xf32>
    %871 = arith.subf %870, %855 : vector<8x2xf32>
    %872 = vector.broadcast %796 : f32 to vector<8x2xf32>
    %873 = arith.mulf %872, %871 : vector<8x2xf32>
    %874 = arith.addf %793, %873 : vector<8x2xf32>
    %875 = arith.mulf %16, %874 : vector<8x2xf32>
    %876 = arith.mulf %874, %874 : vector<8x2xf32>
    %cst_196 = arith.constant 1.000000e+00 : f32
    %877 = vector.broadcast %cst_196 : f32 to vector<8x2xf32>
    %878 = arith.subf %876, %877 : vector<8x2xf32>
    %879 = arith.mulf %875, %878 : vector<8x2xf32>
    %c7_i32_197 = arith.constant 7 : i32
    %880 = tpu.dynamic_rotate %874 by %c7_i32_197 dim 0 : vector<8x2xf32>, i32 -> vector<8x2xf32>
    %c1_i32_198 = arith.constant 1 : i32
    %881 = tpu.dynamic_rotate %874 by %c1_i32_198 dim 0 : vector<8x2xf32>, i32 -> vector<8x2xf32>
    %882 = arith.subf %880, %881 : vector<8x2xf32>
    %883 = arith.mulf %882, %882 : vector<8x2xf32>
    %cst_199 = arith.constant dense<0.000000e+00> : vector<8xf32>
    %884 = vector.multi_reduction <add>, %883, %cst_199 [1] : vector<8x2xf32> to vector<8xf32>
    %885 = vector.shape_cast %884 : vector<8xf32> to vector<8x1xf32>
    %886 = arith.mulf %879, %882 : vector<8x2xf32>
    %cst_200 = arith.constant dense<0.000000e+00> : vector<8xf32>
    %887 = vector.multi_reduction <add>, %886, %cst_200 [1] : vector<8x2xf32> to vector<8xf32>
    %888 = vector.shape_cast %887 : vector<8xf32> to vector<8x1xf32>
    %889 = arith.maximumf %885, %22 : vector<8x1xf32>
    %890 = tpu.reciprocal %889 : vector<8x1xf32> -> vector<8x1xf32>
    %891 = arith.mulf %888, %890 : vector<8x1xf32>
    %892 = vector.broadcast %891 : vector<8x1xf32> to vector<8x2xf32>
    %893 = arith.mulf %892, %882 : vector<8x2xf32>
    %894 = arith.mulf %893, %21 : vector<8x2xf32>
    %895 = arith.subf %894, %879 : vector<8x2xf32>
    %896 = arith.addf %847, %871 : vector<8x2xf32>
    %cst_201 = arith.constant 2.000000e+00 : f32
    %897 = vector.broadcast %cst_201 : f32 to vector<8x2xf32>
    %898 = arith.mulf %897, %896 : vector<8x2xf32>
    %899 = arith.addf %823, %898 : vector<8x2xf32>
    %900 = arith.addf %899, %895 : vector<8x2xf32>
    %901 = vector.broadcast %802 : f32 to vector<8x2xf32>
    %902 = arith.mulf %901, %900 : vector<8x2xf32>
    %903 = arith.addf %793, %902 : vector<8x2xf32>
    %c8_i32 = arith.constant 8 : i32
    %c0_202 = arith.constant 0 : index
    %c0_203 = arith.constant 0 : index
    %904 = vector.load %arg3[%c0_202, %c0_203] : memref<8x2xf32, #tpu.memory_space<vmem>>, vector<8x2xf32>
    tpu.vector_store %arg3[%c0_202, %c0_203], %903 {strides = array<i32>} : memref<8x2xf32, #tpu.memory_space<vmem>>, vector<8x2xf32>,
    return
  }
}

</mosaic_0001>

<bundles_post_ra>
// kernel: differentiable_string_forward.1
= control target key start
LH: loop header
LB: loop body
LE: loop exit
PB: predicated region body
PF: predicated region fallthrough
CT: control target
= control target key end

     0   :  { %8 = vsyncpa [#allocation3], 0  ;;  %s1324_s0 = inlined_call_operand.vmem [shape: f32[24], index: 0, kind: input, shape index: {}]   ;;  %s1325_s1 = inlined_call_operand.vmem [shape: f32[8,2], index: 1, kind: input, shape index: {}]   ;;  %s1326_s2 = inlined_call_operand.vmem [shape: f32[8,1], index: 2, kind: input, shape index: {}]   ;;  %s1327_s3 = inlined_call_operand.vmem [shape: f32[8,2], index: 3, kind: output, shape index: {}]  }
   0x1   :  { %s15_s14 = sshll.u32 %s1324_s0, 4  ;;  %s16_s14 = int_to_ptr.vmem [resolvable:$true] %s15_s14 }
   0x2   :  { %s997_s15 = scalar_lea.vmem %s16_s14, 16  ;;  %p1002_p1 = scmp.lt.s32.totalorder %s16_s14, %s16_s14 }
   0x3   :  { %p998_p0 = scmp.ne.s32.totalorder %s16_s14, %s997_s15  ;;  %p1003_p2 = scmp.lt.s32.totalorder %s997_s15, %s997_s15 }
   0x5   :  { %p1004_p3 = por %p1003_p2, %p1002_p1 }
   0x7   :  { %p1005_p4 = pnand %p1004_p3, %p998_p0 }
   0x9   :  { %1008 = shalt.err (!%p1005_p4)
}
   0xa   :  { %s1011_s16 = smov [#allocation2]  }
   0xb   :  { %18 = dma.vmem_to_smem %s16_s14, 16, %s1011_s16, [#allocation3]  }
   0xc   :  { %1009 = dma.done.wait [#allocation3], 16  }
   0xd   :  { %1010 = vsyncadd [#allocation3], 4294967280 }
   0xe   :  { %26 = sfence }
   0xf   :  { %v1041_v0 = vld [vmem:[%s1325_s1] sm:$0xff]  ;;  %v27_v1 = vlaneseq  ;;  %v1012_v7 = vmov 0   ;;  %vm59_vm0 = vcmask 15360   ;;  %v1013_v12 = vmov 0.0   ;;  %s1056_s1 = sld [smem:[#allocation2 + $0x1]]  ;;  %s873_s20 = sld [smem:[#allocation2 + $0x2]] }
  0x10   :  { %v40_v2 = vld [vmem:[%s1326_s2] sm:$0xff]  ;;  %v55_v3 = vrot.slane %v1041_v0, 1  ;;  %v56_v4 = vrot.slane %v1041_v0, 7  ;;  %931 = vset.pattern.permute.xlu1 %v1012_v7  ;;  %932 = vset.pattern.permute.xlu0 %v1012_v7  ;;  %v52_v11 = vmul.f32 %v1041_v0, %v1041_v0  ;;  %v1014_v14 = vmov 2.0   ;;  %s48_s2 = sld [smem:[#allocation2]]  ;;  %s1092_s21 = sld [smem:[#allocation2 + $0x4]] }
  0x11   :  { %v28_v5 = vshrl.u32 %v27_v1, 7  ;;  %v30_v6 = vand.u32 127, %v27_v1  ;;  %v41_v8 = vsub.f32 1.0, %v40_v2  ;;  %s878_s22 = sld [smem:[#allocation2 + $0x3]]  ;;  %s880_s23 = sld [smem:[#allocation2 + $0x5]] }
  0x12   :  { %v57_v9 = vsub.f32 %v55_v3, %v56_v4  ;;  %v874_v19 = vadd.f32 -1.0, %v52_v11  ;;  %s1126_s24 = sld [smem:[#allocation2 + $0x7]]  ;;  %s885_s25 = sld [smem:[#allocation2 + $0x6]] }
  0x13   :  { %vm31_vm1 = vcmp.gt.s32.totalorder %v28_v5, 0  ;;  %vm32_vm2 = vcmp.lt.s32.totalorder %v28_v5, 7  ;;  %vm36_vm3 = vcmp.eq.s32.totalorder %v30_v6, 0  ;;  %44 = vperm.xlu1 %931, %v41_v8   ;;  %s887_s26 = sld [smem:[#allocation2 + $0x8]]  ;;  %s1160_s27 = sld [smem:[#allocation2 + $0xa]] }
  0x14   :  { %v58_v10 = vmul.f32 %v57_v9, %v57_v9  ;;  %vm33_vm4 = vmand %vm31_vm1, %vm32_vm2  ;;  %v37_v15 = vsel %vm36_vm3, 1.0, %v1014_v14  ;;  %s892_s28 = sld [smem:[#allocation2 + $0x9]]  ;;  %s894_s29 = sld [smem:[#allocation2 + $0xb]] }
  0x15   :  { %v871_v13 = vsel %vm33_vm4, 1.0, %v1013_v12  ;;  %v73_v32 = vstv %s1056_s1  ;;  %s1194_s30 = sld [smem:[#allocation2 + $0xd]]  ;;  %s899_s4 = sld [smem:[#allocation2 + $0xc]] }
  0x16   :  { %v60_v16 = vsel %vm59_vm0, %v58_v10, 0.0  ;;  %v38_v17 = vmul.f32 4.0, %v871_v13  ;;  %v120_v12 = vstv %s48_s2  ;;  %s901_s5 = sld [smem:[#allocation2 + $0xe]]  ;;  %s1228_s6 = sld [smem:[#allocation2 + $0x10]] }
  0x17   :  { %61 = vadd.xlane.f32.xlu0 %v60_v16  ;;  %s906_s7 = sld [smem:[#allocation2 + $0xf]]  ;;  %s908_s8 = sld [smem:[#allocation2 + $0x11]] }
  0x18   :  { %v1051_v18 = vmul.f32 %v38_v17, %v37_v15  ;;  %s1262_s9 = sld [smem:[#allocation2 + $0x13]]  ;;  %s913_s10 = sld [smem:[#allocation2 + $0x12]] }
  0x19   :  { %s915_s11 = sld [smem:[#allocation2 + $0x14]]  ;;  %s1296_s12 = sld [smem:[#allocation2 + $0x16]] }
  0x1a   :  { %v51_v20 = vmul.f32 %v1041_v0, %v1051_v18  ;;  %s920_s13 = sld [smem:[#allocation2 + $0x15]]  ;;  %s922_s14 = sld [smem:[#allocation2 + $0x17]] }
  0x1c   :  { %v54_v21 = vmul.f32 %v874_v19, %v51_v20 }
  0x1e   :  { %v63_v22 = vmul.f32 %v57_v9, %v54_v21 }
  0x20   :  { %v64_v23 = vsel %vm59_vm0, %v63_v22, 0.0 }
  0x21   :  { %65 = vadd.xlane.f32.xlu0 %v64_v23 }
  0x92   :  { %v1058_v29 = vpop.permute.xlu1 %44 }
  0xa4   :  { %v62_v24 = vpop.xlane.xlu0 %61 }
  0xa5   :  { %v67_v25 = vmax.f32 %v62_v24, 1e-20 }
  0xa7   :  { %933 = vrcp.f32 %v67_v25 }
  0xae   :  { %v66_v26 = vpop.xlane.xlu0 %65 }
  0xb1   :  { %v934_v27 = vpop.eup %933 }
  0xb2   :  { %v69_v28 = vmul.f32 %v934_v27, %v66_v26 }
  0xb4   :  { %v70_v30 = vmul.f32 %v69_v28, %v57_v9 }
  0xb6   :  { %v71_v31 = vmul.f32 %v70_v30, %v1058_v29 }
  0xb8   :  { %v1062_v33 = vsub.f32 %v71_v31, %v54_v21 }
  0xba   :  { %v74_v34 = vmul.f32 %v73_v32, %v1062_v33 }
  0xbc   :  { %v75_v35 = vadd.f32 %v74_v34, %v1041_v0 }
  0xbe   :  { %v80_v36 = vrot.slane %v75_v35, 1  ;;  %v81_v37 = vrot.slane %v75_v35, 7  ;;  %v77_v38 = vmul.f32 %v75_v35, %v75_v35  ;;  %v76_v40 = vmul.f32 %v75_v35, %v1051_v18 }
  0xc0   :  { %v82_v39 = vsub.f32 %v80_v36, %v81_v37  ;;  %v875_v41 = vadd.f32 -1.0, %v77_v38 }
  0xc2   :  { %v83_v42 = vmul.f32 %v82_v39, %v82_v39  ;;  %v79_v43 = vmul.f32 %v875_v41, %v76_v40  ;;  %v148_v41 = vstv %s873_s20 }
  0xc4   :  { %v84_v44 = vsel %vm59_vm0, %v83_v42, 0.0  ;;  %v87_v45 = vmul.f32 %v82_v39, %v79_v43 }
  0xc5   :  { %85 = vadd.xlane.f32.xlu1 %v84_v44 }
  0xc6   :  { %v88_v46 = vsel %vm59_vm0, %v87_v45, 0.0 }
  0xc7   :  { %89 = vadd.xlane.f32.xlu0 %v88_v46 }
 0x152   :  { %v86_v47 = vpop.xlane.xlu1 %85 }
 0x153   :  { %v91_v48 = vmax.f32 %v86_v47, 1e-20 }
 0x154   :  { %v90_v50 = vpop.xlane.xlu0 %89 }
 0x155   :  { %935 = vrcp.f32 %v91_v48 }
 0x15f   :  { %v936_v49 = vpop.eup %935 }
 0x160   :  { %v93_v51 = vmul.f32 %v936_v49, %v90_v50 }
 0x162   :  { %v94_v52 = vmul.f32 %v93_v51, %v82_v39 }
 0x164   :  { %v95_v53 = vmul.f32 %v94_v52, %v1058_v29 }
 0x166   :  { %v96_v54 = vsub.f32 %v95_v53, %v79_v43 }
 0x168   :  { %v97_v55 = vmul.f32 %v96_v54, %v73_v32 }
 0x16a   :  { %v98_v56 = vadd.f32 %v97_v55, %v1041_v0 }
 0x16c   :  { %v103_v57 = vrot.slane %v98_v56, 1  ;;  %v104_v58 = vrot.slane %v98_v56, 7  ;;  %v100_v59 = vmul.f32 %v98_v56, %v98_v56  ;;  %v99_v61 = vmul.f32 %v98_v56, %v1051_v18 }
 0x16e   :  { %v105_v60 = vsub.f32 %v103_v57, %v104_v58  ;;  %v876_v62 = vadd.f32 -1.0, %v100_v59 }
 0x170   :  { %v106_v63 = vmul.f32 %v105_v60, %v105_v60  ;;  %v102_v1 = vmul.f32 %v876_v62, %v99_v61  ;;  %v175_v61 = vstv %s1092_s21 }
 0x172   :  { %v107_v2 = vsel %vm59_vm0, %v106_v63, 0.0  ;;  %v110_v3 = vmul.f32 %v105_v60, %v102_v1 }
 0x173   :  { %108 = vadd.xlane.f32.xlu0 %v107_v2 }
 0x174   :  { %v111_v4 = vsel %vm59_vm0, %v110_v3, 0.0 }
 0x177   :  { %112 = vadd.xlane.f32.xlu0 %v111_v4 }
 0x200   :  { %v109_v5 = vpop.xlane.xlu0 %108 }
 0x201   :  { %v114_v6 = vmax.f32 %v109_v5, 1e-20 }
 0x203   :  { %937 = vrcp.f32 %v114_v6 }
 0x204   :  { %v113_v8 = vpop.xlane.xlu0 %112 }
 0x20d   :  { %v938_v7 = vpop.eup %937 }
 0x20e   :  { %v116_v9 = vmul.f32 %v938_v7, %v113_v8 }
 0x210   :  { %v117_v10 = vmul.f32 %v116_v9, %v105_v60 }
 0x212   :  { %v118_v11 = vmul.f32 %v117_v10, %v1058_v29 }
 0x214   :  { %v119_v13 = vsub.f32 %v118_v11, %v102_v1 }
 0x216   :  { %v121_v14 = vmul.f32 %v120_v12, %v119_v13  ;;  %v144_v31 = vadd.f32 %v119_v13, %v96_v54 }
 0x218   :  { %v122_v15 = vadd.f32 %v121_v14, %v1041_v0  ;;  %v145_v36 = vmul.f32 2.0, %v144_v31 }
 0x21a   :  { %v127_v16 = vrot.slane %v122_v15, 1  ;;  %v128_v17 = vrot.slane %v122_v15, 7  ;;  %v124_v19 = vmul.f32 %v122_v15, %v122_v15  ;;  %v123_v21 = vmul.f32 %v122_v15, %v1051_v18 }
 0x21b   :  { %v146_v39 = vadd.f32 %v145_v36, %v1062_v33 }
 0x21c   :  { %v129_v20 = vsub.f32 %v127_v16, %v128_v17  ;;  %v877_v22 = vadd.f32 -1.0, %v124_v19 }
 0x21e   :  { %v130_v23 = vmul.f32 %v129_v20, %v129_v20  ;;  %v126_v24 = vmul.f32 %v877_v22, %v123_v21 }
 0x220   :  { %v131_v25 = vsel %vm59_vm0, %v130_v23, 0.0  ;;  %v134_v26 = vmul.f32 %v129_v20, %v126_v24 }
 0x221   :  { %132 = vadd.xlane.f32.xlu0 %v131_v25 }
 0x222   :  { %v135_v27 = vsel %vm59_vm0, %v134_v26, 0.0 }
 0x225   :  { %136 = vadd.xlane.f32.xlu0 %v135_v27 }
 0x2ae   :  { %v133_v28 = vpop.xlane.xlu0 %132 }
 0x2af   :  { %v138_v30 = vmax.f32 %v133_v28, 1e-20 }
 0x2b1   :  { %939 = vrcp.f32 %v138_v30 }
 0x2b2   :  { %v137_v34 = vpop.xlane.xlu0 %136 }
 0x2bb   :  { %v940_v32 = vpop.eup %939 }
 0x2bc   :  { %v140_v35 = vmul.f32 %v940_v32, %v137_v34 }
 0x2be   :  { %v141_v37 = vmul.f32 %v140_v35, %v129_v20 }
 0x2c0   :  { %v142_v38 = vmul.f32 %v141_v37, %v1058_v29 }
 0x2c2   :  { %v143_v40 = vsub.f32 %v142_v38, %v126_v24 }
 0x2c4   :  { %v147_v42 = vadd.f32 %v146_v39, %v143_v40 }
 0x2c6   :  { %v149_v43 = vmul.f32 %v148_v41, %v147_v42 }
 0x2c8   :  { %v1082_v44 = vadd.f32 %v149_v43, %v1041_v0 }
 0x2ca   :  { %v158_v45 = vrot.slane %v1082_v44, 1  ;;  %v159_v46 = vrot.slane %v1082_v44, 7  ;;  %v155_v47 = vmul.f32 %v1082_v44, %v1082_v44  ;;  %v154_v49 = vmul.f32 %v1082_v44, %v1051_v18 }
 0x2cc   :  { %v160_v48 = vsub.f32 %v158_v45, %v159_v46  ;;  %v881_v50 = vadd.f32 -1.0, %v155_v47  ;;  %v222_v45 = vstv %s878_s22 }
 0x2ce   :  { %v161_v33 = vmul.f32 %v160_v48, %v160_v48  ;;  %v157_v51 = vmul.f32 %v881_v50, %v154_v49 }
 0x2d0   :  { %v162_v52 = vsel %vm59_vm0, %v161_v33, 0.0  ;;  %v165_v53 = vmul.f32 %v160_v48, %v157_v51 }
 0x2d1   :  { %163 = vadd.xlane.f32.xlu0 %v162_v52 }
 0x2d2   :  { %v166_v0 = vsel %vm59_vm0, %v165_v53, 0.0 }
 0x2d5   :  { %167 = vadd.xlane.f32.xlu0 %v166_v0 }
 0x35e   :  { %v164_v54 = vpop.xlane.xlu0 %163 }
 0x35f   :  { %v169_v55 = vmax.f32 %v164_v54, 1e-20 }
 0x361   :  { %941 = vrcp.f32 %v169_v55 }
 0x362   :  { %v168_v57 = vpop.xlane.xlu0 %167 }
 0x36b   :  { %v942_v56 = vpop.eup %941 }
 0x36c   :  { %v171_v58 = vmul.f32 %v942_v56, %v168_v57 }
 0x36e   :  { %v172_v59 = vmul.f32 %v171_v58, %v160_v48 }
 0x370   :  { %v173_v60 = vmul.f32 %v172_v59, %v1058_v29 }
 0x372   :  { %v1096_v62 = vsub.f32 %v173_v60, %v157_v51 }
 0x374   :  { %v176_v63 = vmul.f32 %v175_v61, %v1096_v62 }
 0x376   :  { %v177_v1 = vadd.f32 %v176_v63, %v1082_v44 }
 0x378   :  { %v182_v2 = vrot.slane %v177_v1, 1  ;;  %v183_v3 = vrot.slane %v177_v1, 7  ;;  %v179_v4 = vmul.f32 %v177_v1, %v177_v1  ;;  %v178_v6 = vmul.f32 %v177_v1, %v1051_v18 }
 0x37a   :  { %v184_v5 = vsub.f32 %v182_v2, %v183_v3  ;;  %v882_v7 = vadd.f32 -1.0, %v179_v4 }
 0x37c   :  { %v185_v8 = vmul.f32 %v184_v5, %v184_v5  ;;  %v181_v9 = vmul.f32 %v882_v7, %v178_v6  ;;  %v250_v7 = vstv %s880_s23 }
 0x37e   :  { %v186_v10 = vsel %vm59_vm0, %v185_v8, 0.0  ;;  %v189_v11 = vmul.f32 %v184_v5, %v181_v9 }
 0x37f   :  { %187 = vadd.xlane.f32.xlu0 %v186_v10 }
 0x380   :  { %v190_v12 = vsel %vm59_vm0, %v189_v11, 0.0 }
 0x383   :  { %191 = vadd.xlane.f32.xlu0 %v190_v12 }
 0x40c   :  { %v188_v13 = vpop.xlane.xlu0 %187 }
 0x40d   :  { %v193_v14 = vmax.f32 %v188_v13, 1e-20 }
 0x40f   :  { %943 = vrcp.f32 %v193_v14 }
 0x410   :  { %v192_v16 = vpop.xlane.xlu0 %191 }
 0x419   :  { %v944_v15 = vpop.eup %943 }
 0x41a   :  { %v195_v17 = vmul.f32 %v944_v15, %v192_v16 }
 0x41c   :  { %v196_v19 = vmul.f32 %v195_v17, %v184_v5 }
 0x41e   :  { %v197_v20 = vmul.f32 %v196_v19, %v1058_v29 }
 0x420   :  { %v198_v21 = vsub.f32 %v197_v20, %v181_v9 }
 0x422   :  { %v199_v22 = vmul.f32 %v198_v21, %v175_v61 }
 0x424   :  { %v200_v23 = vadd.f32 %v199_v22, %v1082_v44 }
 0x426   :  { %v205_v24 = vrot.slane %v200_v23, 1  ;;  %v206_v25 = vrot.slane %v200_v23, 7  ;;  %v202_v26 = vmul.f32 %v200_v23, %v200_v23  ;;  %v201_v28 = vmul.f32 %v200_v23, %v1051_v18 }
 0x428   :  { %v207_v27 = vsub.f32 %v205_v24, %v206_v25  ;;  %v883_v30 = vadd.f32 -1.0, %v202_v26 }
 0x42a   :  { %v208_v31 = vmul.f32 %v207_v27, %v207_v27  ;;  %v204_v32 = vmul.f32 %v883_v30, %v201_v28  ;;  %v277_v28 = vstv %s1126_s24 }
 0x42c   :  { %v209_v34 = vsel %vm59_vm0, %v208_v31, 0.0  ;;  %v212_v35 = vmul.f32 %v207_v27, %v204_v32 }
 0x42d   :  { %210 = vadd.xlane.f32.xlu1 %v209_v34 }
 0x42e   :  { %v213_v36 = vsel %vm59_vm0, %v212_v35, 0.0 }
 0x42f   :  { %214 = vadd.xlane.f32.xlu0 %v213_v36 }
 0x4ba   :  { %v211_v37 = vpop.xlane.xlu1 %210 }
 0x4bb   :  { %v216_v38 = vmax.f32 %v211_v37, 1e-20 }
 0x4bc   :  { %v215_v40 = vpop.xlane.xlu0 %214 }
 0x4bd   :  { %945 = vrcp.f32 %v216_v38 }
 0x4c7   :  { %v946_v39 = vpop.eup %945 }
 0x4c8   :  { %v218_v41 = vmul.f32 %v946_v39, %v215_v40 }
 0x4ca   :  { %v219_v42 = vmul.f32 %v218_v41, %v207_v27 }
 0x4cc   :  { %v220_v43 = vmul.f32 %v219_v42, %v1058_v29 }
 0x4ce   :  { %v221_v46 = vsub.f32 %v220_v43, %v204_v32 }
 0x4d0   :  { %v223_v47 = vmul.f32 %v222_v45, %v221_v46  ;;  %v246_v60 = vadd.f32 %v221_v46, %v198_v21 }
 0x4d2   :  { %v224_v48 = vadd.f32 %v223_v47, %v1082_v44  ;;  %v247_v2 = vmul.f32 2.0, %v246_v60 }
 0x4d4   :  { %v229_v49 = vrot.slane %v224_v48, 1  ;;  %v230_v50 = vrot.slane %v224_v48, 7  ;;  %v226_v33 = vmul.f32 %v224_v48, %v224_v48  ;;  %v225_v52 = vmul.f32 %v224_v48, %v1051_v18 }
 0x4d5   :  { %v248_v5 = vadd.f32 %v247_v2, %v1096_v62 }
 0x4d6   :  { %v231_v51 = vsub.f32 %v229_v49, %v230_v50  ;;  %v884_v53 = vadd.f32 -1.0, %v226_v33 }
 0x4d8   :  { %v232_v0 = vmul.f32 %v231_v51, %v231_v51  ;;  %v228_v54 = vmul.f32 %v884_v53, %v225_v52 }
 0x4da   :  { %v233_v55 = vsel %vm59_vm0, %v232_v0, 0.0  ;;  %v236_v56 = vmul.f32 %v231_v51, %v228_v54 }
 0x4db   :  { %234 = vadd.xlane.f32.xlu1 %v233_v55 }
 0x4dc   :  { %v237_v57 = vsel %vm59_vm0, %v236_v56, 0.0 }
 0x4dd   :  { %238 = vadd.xlane.f32.xlu0 %v237_v57 }
 0x568   :  { %v235_v58 = vpop.xlane.xlu1 %234 }
 0x569   :  { %v240_v59 = vmax.f32 %v235_v58, 1e-20 }
 0x56a   :  { %v239_v63 = vpop.xlane.xlu0 %238 }
 0x56b   :  { %947 = vrcp.f32 %v240_v59 }
 0x575   :  { %v948_v61 = vpop.eup %947 }
 0x576   :  { %v242_v1 = vmul.f32 %v948_v61, %v239_v63 }
 0x578   :  { %v243_v3 = vmul.f32 %v242_v1, %v231_v51 }
 0x57a   :  { %v244_v4 = vmul.f32 %v243_v3, %v1058_v29 }
 0x57c   :  { %v245_v6 = vsub.f32 %v244_v4, %v228_v54 }
 0x57e   :  { %v249_v8 = vadd.f32 %v248_v5, %v245_v6 }
 0x580   :  { %v251_v9 = vmul.f32 %v250_v7, %v249_v8 }
 0x582   :  { %v1116_v10 = vadd.f32 %v251_v9, %v1082_v44 }
 0x584   :  { %v260_v11 = vrot.slane %v1116_v10, 1  ;;  %v261_v12 = vrot.slane %v1116_v10, 7  ;;  %v257_v13 = vmul.f32 %v1116_v10, %v1116_v10  ;;  %v256_v15 = vmul.f32 %v1116_v10, %v1051_v18 }
 0x586   :  { %v262_v14 = vsub.f32 %v260_v11, %v261_v12  ;;  %v888_v16 = vadd.f32 -1.0, %v257_v13  ;;  %v324_v11 = vstv %s885_s25 }
 0x588   :  { %v263_v62 = vmul.f32 %v262_v14, %v262_v14  ;;  %v259_v17 = vmul.f32 %v888_v16, %v256_v15 }
 0x58a   :  { %v264_v19 = vsel %vm59_vm0, %v263_v62, 0.0  ;;  %v267_v20 = vmul.f32 %v262_v14, %v259_v17 }
 0x58b   :  { %265 = vadd.xlane.f32.xlu1 %v264_v19 }
 0x58c   :  { %v268_v44 = vsel %vm59_vm0, %v267_v20, 0.0 }
 0x58d   :  { %269 = vadd.xlane.f32.xlu0 %v268_v44 }
 0x618   :  { %v266_v21 = vpop.xlane.xlu1 %265 }
 0x619   :  { %v271_v22 = vmax.f32 %v266_v21, 1e-20 }
 0x61a   :  { %v270_v24 = vpop.xlane.xlu0 %269 }
 0x61b   :  { %949 = vrcp.f32 %v271_v22 }
 0x625   :  { %v950_v23 = vpop.eup %949 }
 0x626   :  { %v273_v25 = vmul.f32 %v950_v23, %v270_v24 }
 0x628   :  { %v274_v26 = vmul.f32 %v273_v25, %v262_v14 }
 0x62a   :  { %v275_v27 = vmul.f32 %v274_v26, %v1058_v29 }
 0x62c   :  { %v1130_v30 = vsub.f32 %v275_v27, %v259_v17 }
 0x62e   :  { %v278_v31 = vmul.f32 %v277_v28, %v1130_v30 }
 0x630   :  { %v279_v32 = vadd.f32 %v278_v31, %v1116_v10 }
 0x632   :  { %v284_v34 = vrot.slane %v279_v32, 1  ;;  %v285_v35 = vrot.slane %v279_v32, 7  ;;  %v281_v36 = vmul.f32 %v279_v32, %v279_v32  ;;  %v280_v38 = vmul.f32 %v279_v32, %v1051_v18 }
 0x634   :  { %v286_v37 = vsub.f32 %v284_v34, %v285_v35  ;;  %v889_v39 = vadd.f32 -1.0, %v281_v36 }
 0x636   :  { %v287_v40 = vmul.f32 %v286_v37, %v286_v37  ;;  %v283_v41 = vmul.f32 %v889_v39, %v280_v38  ;;  %v352_v39 = vstv %s887_s26 }
 0x638   :  { %v288_v42 = vsel %vm59_vm0, %v287_v40, 0.0  ;;  %v291_v43 = vmul.f32 %v286_v37, %v283_v41 }
 0x639   :  { %289 = vadd.xlane.f32.xlu1 %v288_v42 }
 0x63a   :  { %v292_v45 = vsel %vm59_vm0, %v291_v43, 0.0 }
 0x63b   :  { %293 = vadd.xlane.f32.xlu0 %v292_v45 }
 0x6c6   :  { %v290_v46 = vpop.xlane.xlu1 %289 }
 0x6c7   :  { %v295_v47 = vmax.f32 %v290_v46, 1e-20 }
 0x6c8   :  { %v294_v49 = vpop.xlane.xlu0 %293 }
 0x6c9   :  { %951 = vrcp.f32 %v295_v47 }
 0x6d3   :  { %v952_v48 = vpop.eup %951 }
 0x6d4   :  { %v297_v50 = vmul.f32 %v952_v48, %v294_v49 }
 0x6d6   :  { %v298_v33 = vmul.f32 %v297_v50, %v286_v37 }
 0x6d8   :  { %v299_v51 = vmul.f32 %v298_v33, %v1058_v29 }
 0x6da   :  { %v300_v52 = vsub.f32 %v299_v51, %v283_v41 }
 0x6dc   :  { %v301_v53 = vmul.f32 %v300_v52, %v277_v28 }
 0x6de   :  { %v302_v0 = vadd.f32 %v301_v53, %v1116_v10 }
 0x6e0   :  { %v307_v54 = vrot.slane %v302_v0, 1  ;;  %v308_v55 = vrot.slane %v302_v0, 7  ;;  %v304_v56 = vmul.f32 %v302_v0, %v302_v0  ;;  %v303_v58 = vmul.f32 %v302_v0, %v1051_v18 }
 0x6e2   :  { %v309_v57 = vsub.f32 %v307_v54, %v308_v55  ;;  %v890_v59 = vadd.f32 -1.0, %v304_v56 }
 0x6e4   :  { %v310_v60 = vmul.f32 %v309_v57, %v309_v57  ;;  %v306_v61 = vmul.f32 %v890_v59, %v303_v58  ;;  %v379_v58 = vstv %s1160_s27 }
 0x6e6   :  { %v311_v63 = vsel %vm59_vm0, %v310_v60, 0.0  ;;  %v314_v1 = vmul.f32 %v309_v57, %v306_v61 }
 0x6e7   :  { %312 = vadd.xlane.f32.xlu1 %v311_v63 }
 0x6e8   :  { %v315_v2 = vsel %vm59_vm0, %v314_v1, 0.0 }
 0x6e9   :  { %316 = vadd.xlane.f32.xlu0 %v315_v2 }
 0x774   :  { %v313_v3 = vpop.xlane.xlu1 %312 }
 0x775   :  { %v318_v4 = vmax.f32 %v313_v3, 1e-20 }
 0x776   :  { %v317_v6 = vpop.xlane.xlu0 %316 }
 0x777   :  { %953 = vrcp.f32 %v318_v4 }
 0x781   :  { %v954_v5 = vpop.eup %953 }
 0x782   :  { %v320_v7 = vmul.f32 %v954_v5, %v317_v6 }
 0x784   :  { %v321_v8 = vmul.f32 %v320_v7, %v309_v57 }
 0x786   :  { %v322_v9 = vmul.f32 %v321_v8, %v1058_v29 }
 0x788   :  { %v323_v12 = vsub.f32 %v322_v9, %v306_v61 }
 0x78a   :  { %v325_v13 = vmul.f32 %v324_v11, %v323_v12  ;;  %v348_v27 = vadd.f32 %v323_v12, %v300_v52 }
 0x78c   :  { %v326_v14 = vadd.f32 %v325_v13, %v1116_v10  ;;  %v349_v34 = vmul.f32 2.0, %v348_v27 }
 0x78e   :  { %v331_v15 = vrot.slane %v326_v14, 1  ;;  %v332_v16 = vrot.slane %v326_v14, 7  ;;  %v328_v62 = vmul.f32 %v326_v14, %v326_v14  ;;  %v327_v19 = vmul.f32 %v326_v14, %v1051_v18 }
 0x78f   :  { %v350_v37 = vadd.f32 %v349_v34, %v1130_v30 }
 0x790   :  { %v333_v17 = vsub.f32 %v331_v15, %v332_v16  ;;  %v891_v20 = vadd.f32 -1.0, %v328_v62 }
 0x792   :  { %v334_v44 = vmul.f32 %v333_v17, %v333_v17  ;;  %v330_v21 = vmul.f32 %v891_v20, %v327_v19 }
 0x794   :  { %v335_v22 = vsel %vm59_vm0, %v334_v44, 0.0  ;;  %v338_v23 = vmul.f32 %v333_v17, %v330_v21 }
 0x795   :  { %336 = vadd.xlane.f32.xlu1 %v335_v22 }
 0x796   :  { %v339_v24 = vsel %vm59_vm0, %v338_v23, 0.0 }
 0x797   :  { %340 = vadd.xlane.f32.xlu0 %v339_v24 }
 0x822   :  { %v337_v25 = vpop.xlane.xlu1 %336 }
 0x823   :  { %v342_v26 = vmax.f32 %v337_v25, 1e-20 }
 0x824   :  { %v341_v31 = vpop.xlane.xlu0 %340 }
 0x825   :  { %955 = vrcp.f32 %v342_v26 }
 0x82f   :  { %v956_v28 = vpop.eup %955 }
 0x830   :  { %v344_v32 = vmul.f32 %v956_v28, %v341_v31 }
 0x832   :  { %v345_v35 = vmul.f32 %v344_v32, %v333_v17 }
 0x834   :  { %v346_v36 = vmul.f32 %v345_v35, %v1058_v29 }
 0x836   :  { %v347_v38 = vsub.f32 %v346_v36, %v330_v21 }
 0x838   :  { %v351_v40 = vadd.f32 %v350_v37, %v347_v38 }
 0x83a   :  { %v353_v41 = vmul.f32 %v352_v39, %v351_v40 }
 0x83c   :  { %v1150_v42 = vadd.f32 %v353_v41, %v1116_v10 }
 0x83e   :  { %v362_v43 = vrot.slane %v1150_v42, 1  ;;  %v363_v45 = vrot.slane %v1150_v42, 7  ;;  %v359_v46 = vmul.f32 %v1150_v42, %v1150_v42  ;;  %v358_v48 = vmul.f32 %v1150_v42, %v1051_v18 }
 0x840   :  { %v364_v47 = vsub.f32 %v362_v43, %v363_v45  ;;  %v895_v49 = vadd.f32 -1.0, %v359_v46  ;;  %v426_v43 = vstv %s892_s28 }
 0x842   :  { %v365_v30 = vmul.f32 %v364_v47, %v364_v47  ;;  %v361_v50 = vmul.f32 %v895_v49, %v358_v48 }
 0x844   :  { %v366_v33 = vsel %vm59_vm0, %v365_v30, 0.0  ;;  %v369_v51 = vmul.f32 %v364_v47, %v361_v50 }
 0x845   :  { %367 = vadd.xlane.f32.xlu1 %v366_v33 }
 0x846   :  { %v370_v10 = vsel %vm59_vm0, %v369_v51, 0.0 }
 0x847   :  { %371 = vadd.xlane.f32.xlu0 %v370_v10 }
 0x8d2   :  { %v368_v52 = vpop.xlane.xlu1 %367 }
 0x8d3   :  { %v373_v53 = vmax.f32 %v368_v52, 1e-20 }
 0x8d4   :  { %v372_v54 = vpop.xlane.xlu0 %371 }
 0x8d5   :  { %957 = vrcp.f32 %v373_v53 }
 0x8df   :  { %v958_v0 = vpop.eup %957 }
 0x8e0   :  { %v375_v55 = vmul.f32 %v958_v0, %v372_v54 }
 0x8e2   :  { %v376_v56 = vmul.f32 %v375_v55, %v364_v47 }
 0x8e4   :  { %v377_v57 = vmul.f32 %v376_v56, %v1058_v29 }
 0x8e6   :  { %v1164_v59 = vsub.f32 %v377_v57, %v361_v50 }
 0x8e8   :  { %v380_v60 = vmul.f32 %v379_v58, %v1164_v59 }
 0x8ea   :  { %v381_v61 = vadd.f32 %v380_v60, %v1150_v42 }
 0x8ec   :  { %v386_v63 = vrot.slane %v381_v61, 1  ;;  %v387_v1 = vrot.slane %v381_v61, 7  ;;  %v383_v2 = vmul.f32 %v381_v61, %v381_v61  ;;  %v382_v4 = vmul.f32 %v381_v61, %v1051_v18 }
 0x8ee   :  { %v388_v3 = vsub.f32 %v386_v63, %v387_v1  ;;  %v896_v5 = vadd.f32 -1.0, %v383_v2 }
 0x8f0   :  { %v389_v6 = vmul.f32 %v388_v3, %v388_v3  ;;  %v385_v7 = vmul.f32 %v896_v5, %v382_v4  ;;  %v454_v5 = vstv %s894_s29 }
 0x8f2   :  { %v390_v8 = vsel %vm59_vm0, %v389_v6, 0.0  ;;  %v393_v9 = vmul.f32 %v388_v3, %v385_v7 }
 0x8f3   :  { %391 = vadd.xlane.f32.xlu1 %v390_v8 }
 0x8f4   :  { %v394_v11 = vsel %vm59_vm0, %v393_v9, 0.0 }
 0x8f5   :  { %395 = vadd.xlane.f32.xlu0 %v394_v11 }
 0x980   :  { %v392_v12 = vpop.xlane.xlu1 %391 }
 0x981   :  { %v397_v13 = vmax.f32 %v392_v12, 1e-20 }
 0x982   :  { %v396_v15 = vpop.xlane.xlu0 %395 }
 0x983   :  { %959 = vrcp.f32 %v397_v13 }
 0x98d   :  { %v960_v14 = vpop.eup %959 }
 0x98e   :  { %v399_v16 = vmul.f32 %v960_v14, %v396_v15 }
 0x990   :  { %v400_v62 = vmul.f32 %v399_v16, %v388_v3 }
 0x992   :  { %v401_v17 = vmul.f32 %v400_v62, %v1058_v29 }
 0x994   :  { %v402_v19 = vsub.f32 %v401_v17, %v385_v7 }
 0x996   :  { %v403_v20 = vmul.f32 %v402_v19, %v379_v58 }
 0x998   :  { %v404_v44 = vadd.f32 %v403_v20, %v1150_v42 }
 0x99a   :  { %v409_v21 = vrot.slane %v404_v44, 1  ;;  %v410_v22 = vrot.slane %v404_v44, 7  ;;  %v406_v23 = vmul.f32 %v404_v44, %v404_v44  ;;  %v405_v25 = vmul.f32 %v404_v44, %v1051_v18 }
 0x99c   :  { %v411_v24 = vsub.f32 %v409_v21, %v410_v22  ;;  %v897_v26 = vadd.f32 -1.0, %v406_v23 }
 0x99e   :  { %v412_v27 = vmul.f32 %v411_v24, %v411_v24  ;;  %v408_v28 = vmul.f32 %v897_v26, %v405_v25  ;;  %v481_v25 = vstv %s1194_s30 }
 0x9a0   :  { %v413_v31 = vsel %vm59_vm0, %v412_v27, 0.0  ;;  %v416_v32 = vmul.f32 %v411_v24, %v408_v28 }
 0x9a1   :  { %414 = vadd.xlane.f32.xlu1 %v413_v31 }
 0x9a2   :  { %v417_v34 = vsel %vm59_vm0, %v416_v32, 0.0 }
 0x9a3   :  { %418 = vadd.xlane.f32.xlu0 %v417_v34 }
 0xa2e   :  { %v415_v35 = vpop.xlane.xlu1 %414 }
 0xa2f   :  { %v420_v36 = vmax.f32 %v415_v35, 1e-20 }
 0xa30   :  { %v419_v38 = vpop.xlane.xlu0 %418 }
 0xa31   :  { %961 = vrcp.f32 %v420_v36 }
 0xa3b   :  { %v962_v37 = vpop.eup %961 }
 0xa3c   :  { %v422_v39 = vmul.f32 %v962_v37, %v419_v38 }
 0xa3e   :  { %v423_v40 = vmul.f32 %v422_v39, %v411_v24 }
 0xa40   :  { %v424_v41 = vmul.f32 %v423_v40, %v1058_v29 }
 0xa42   :  { %v425_v45 = vsub.f32 %v424_v41, %v408_v28 }
 0xa44   :  { %v427_v46 = vmul.f32 %v426_v43, %v425_v45  ;;  %v450_v57 = vadd.f32 %v425_v45, %v402_v19 }
 0xa46   :  { %v428_v47 = vadd.f32 %v427_v46, %v1150_v42  ;;  %v451_v63 = vmul.f32 2.0, %v450_v57 }
 0xa48   :  { %v433_v48 = vrot.slane %v428_v47, 1  ;;  %v434_v49 = vrot.slane %v428_v47, 7  ;;  %v430_v30 = vmul.f32 %v428_v47, %v428_v47  ;;  %v429_v33 = vmul.f32 %v428_v47, %v1051_v18 }
 0xa49   :  { %v452_v3 = vadd.f32 %v451_v63, %v1164_v59 }
 0xa4a   :  { %v435_v50 = vsub.f32 %v433_v48, %v434_v49  ;;  %v898_v51 = vadd.f32 -1.0, %v430_v30 }
 0xa4c   :  { %v436_v10 = vmul.f32 %v435_v50, %v435_v50  ;;  %v432_v52 = vmul.f32 %v898_v51, %v429_v33 }
 0xa4e   :  { %v437_v53 = vsel %vm59_vm0, %v436_v10, 0.0  ;;  %v440_v0 = vmul.f32 %v435_v50, %v432_v52 }
 0xa4f   :  { %438 = vadd.xlane.f32.xlu1 %v437_v53 }
 0xa50   :  { %v441_v54 = vsel %vm59_vm0, %v440_v0, 0.0 }
 0xa51   :  { %442 = vadd.xlane.f32.xlu0 %v441_v54 }
 0xadc   :  { %v439_v55 = vpop.xlane.xlu1 %438 }
 0xadd   :  { %v444_v56 = vmax.f32 %v439_v55, 1e-20 }
 0xade   :  { %v443_v60 = vpop.xlane.xlu0 %442 }
 0xadf   :  { %963 = vrcp.f32 %v444_v56 }
 0xae9   :  { %v964_v58 = vpop.eup %963 }
 0xaea   :  { %v446_v61 = vmul.f32 %v964_v58, %v443_v60 }
 0xaec   :  { %v447_v1 = vmul.f32 %v446_v61, %v435_v50 }
 0xaee   :  { %v448_v2 = vmul.f32 %v447_v1, %v1058_v29 }
 0xaf0   :  { %v449_v4 = vsub.f32 %v448_v2, %v432_v52 }
 0xaf2   :  { %v453_v6 = vadd.f32 %v452_v3, %v449_v4 }
 0xaf4   :  { %v455_v7 = vmul.f32 %v454_v5, %v453_v6 }
 0xaf6   :  { %v1184_v8 = vadd.f32 %v455_v7, %v1150_v42 }
 0xaf8   :  { %v464_v9 = vrot.slane %v1184_v8, 1  ;;  %v465_v11 = vrot.slane %v1184_v8, 7  ;;  %v461_v12 = vmul.f32 %v1184_v8, %v1184_v8  ;;  %v460_v14 = vmul.f32 %v1184_v8, %v1051_v18 }
 0xafa   :  { %v466_v13 = vsub.f32 %v464_v9, %v465_v11  ;;  %v902_v15 = vadd.f32 -1.0, %v461_v12  ;;  %v528_v9 = vstv %s899_s4 }
 0xafc   :  { %v467_v59 = vmul.f32 %v466_v13, %v466_v13  ;;  %v463_v16 = vmul.f32 %v902_v15, %v460_v14 }
 0xafe   :  { %v468_v62 = vsel %vm59_vm0, %v467_v59, 0.0  ;;  %v471_v17 = vmul.f32 %v466_v13, %v463_v16 }
 0xaff   :  { %469 = vadd.xlane.f32.xlu1 %v468_v62 }
 0xb00   :  { %v472_v42 = vsel %vm59_vm0, %v471_v17, 0.0 }
 0xb01   :  { %473 = vadd.xlane.f32.xlu0 %v472_v42 }
 0xb8c   :  { %v470_v19 = vpop.xlane.xlu1 %469 }
 0xb8d   :  { %v475_v20 = vmax.f32 %v470_v19, 1e-20 }
 0xb8e   :  { %v474_v21 = vpop.xlane.xlu0 %473 }
 0xb8f   :  { %965 = vrcp.f32 %v475_v20 }
 0xb99   :  { %v966_v44 = vpop.eup %965 }
 0xb9a   :  { %v477_v22 = vmul.f32 %v966_v44, %v474_v21 }
 0xb9c   :  { %v478_v23 = vmul.f32 %v477_v22, %v466_v13 }
 0xb9e   :  { %v479_v24 = vmul.f32 %v478_v23, %v1058_v29 }
 0xba0   :  { %v1198_v26 = vsub.f32 %v479_v24, %v463_v16 }
 0xba2   :  { %v482_v27 = vmul.f32 %v481_v25, %v1198_v26 }
 0xba4   :  { %v483_v28 = vadd.f32 %v482_v27, %v1184_v8 }
 0xba6   :  { %v488_v31 = vrot.slane %v483_v28, 1  ;;  %v489_v32 = vrot.slane %v483_v28, 7  ;;  %v485_v34 = vmul.f32 %v483_v28, %v483_v28  ;;  %v484_v36 = vmul.f32 %v483_v28, %v1051_v18 }
 0xba8   :  { %v490_v35 = vsub.f32 %v488_v31, %v489_v32  ;;  %v903_v37 = vadd.f32 -1.0, %v485_v34 }
 0xbaa   :  { %v491_v38 = vmul.f32 %v490_v35, %v490_v35  ;;  %v487_v39 = vmul.f32 %v903_v37, %v484_v36  ;;  %v556_v37 = vstv %s901_s5 }
 0xbac   :  { %v492_v40 = vsel %vm59_vm0, %v491_v38, 0.0  ;;  %v495_v41 = vmul.f32 %v490_v35, %v487_v39 }
 0xbad   :  { %493 = vadd.xlane.f32.xlu1 %v492_v40 }
 0xbae   :  { %v496_v43 = vsel %vm59_vm0, %v495_v41, 0.0 }
 0xbaf   :  { %497 = vadd.xlane.f32.xlu0 %v496_v43 }
 0xc3a   :  { %v494_v45 = vpop.xlane.xlu1 %493 }
 0xc3b   :  { %v499_v46 = vmax.f32 %v494_v45, 1e-20 }
 0xc3c   :  { %v498_v48 = vpop.xlane.xlu0 %497 }
 0xc3d   :  { %967 = vrcp.f32 %v499_v46 }
 0xc47   :  { %v968_v47 = vpop.eup %967 }
 0xc48   :  { %v501_v49 = vmul.f32 %v968_v47, %v498_v48 }
 0xc4a   :  { %v502_v30 = vmul.f32 %v501_v49, %v490_v35 }
 0xc4c   :  { %v503_v50 = vmul.f32 %v502_v30, %v1058_v29 }
 0xc4e   :  { %v504_v33 = vsub.f32 %v503_v50, %v487_v39 }
 0xc50   :  { %v505_v51 = vmul.f32 %v504_v33, %v481_v25 }
 0xc52   :  { %v506_v10 = vadd.f32 %v505_v51, %v1184_v8 }
 0xc54   :  { %v511_v52 = vrot.slane %v506_v10, 1  ;;  %v512_v53 = vrot.slane %v506_v10, 7  ;;  %v508_v0 = vmul.f32 %v506_v10, %v506_v10  ;;  %v507_v55 = vmul.f32 %v506_v10, %v1051_v18 }
 0xc56   :  { %v513_v54 = vsub.f32 %v511_v52, %v512_v53  ;;  %v904_v56 = vadd.f32 -1.0, %v508_v0 }
 0xc58   :  { %v514_v57 = vmul.f32 %v513_v54, %v513_v54  ;;  %v510_v58 = vmul.f32 %v904_v56, %v507_v55  ;;  %v583_v55 = vstv %s1228_s6 }
 0xc5a   :  { %v515_v60 = vsel %vm59_vm0, %v514_v57, 0.0  ;;  %v518_v61 = vmul.f32 %v513_v54, %v510_v58 }
 0xc5b   :  { %516 = vadd.xlane.f32.xlu1 %v515_v60 }
 0xc5c   :  { %v519_v63 = vsel %vm59_vm0, %v518_v61, 0.0 }
 0xc5d   :  { %520 = vadd.xlane.f32.xlu0 %v519_v63 }
 0xce8   :  { %v517_v1 = vpop.xlane.xlu1 %516 }
 0xce9   :  { %v522_v2 = vmax.f32 %v517_v1, 1e-20 }
 0xcea   :  { %v521_v4 = vpop.xlane.xlu0 %520 }
 0xceb   :  { %969 = vrcp.f32 %v522_v2 }
 0xcf5   :  { %v970_v3 = vpop.eup %969 }
 0xcf6   :  { %v524_v5 = vmul.f32 %v970_v3, %v521_v4 }
 0xcf8   :  { %v525_v6 = vmul.f32 %v524_v5, %v513_v54 }
 0xcfa   :  { %v526_v7 = vmul.f32 %v525_v6, %v1058_v29 }
 0xcfc   :  { %v527_v11 = vsub.f32 %v526_v7, %v510_v58 }
 0xcfe   :  { %v529_v12 = vmul.f32 %v528_v9, %v527_v11  ;;  %v552_v24 = vadd.f32 %v527_v11, %v504_v33 }
 0xd00   :  { %v530_v13 = vadd.f32 %v529_v12, %v1184_v8  ;;  %v553_v31 = vmul.f32 2.0, %v552_v24 }
 0xd02   :  { %v535_v14 = vrot.slane %v530_v13, 1  ;;  %v536_v15 = vrot.slane %v530_v13, 7  ;;  %v532_v59 = vmul.f32 %v530_v13, %v530_v13  ;;  %v531_v62 = vmul.f32 %v530_v13, %v1051_v18 }
 0xd03   :  { %v554_v35 = vadd.f32 %v553_v31, %v1198_v26 }
 0xd04   :  { %v537_v16 = vsub.f32 %v535_v14, %v536_v15  ;;  %v905_v17 = vadd.f32 -1.0, %v532_v59 }
 0xd06   :  { %v538_v42 = vmul.f32 %v537_v16, %v537_v16  ;;  %v534_v19 = vmul.f32 %v905_v17, %v531_v62 }
 0xd08   :  { %v539_v20 = vsel %vm59_vm0, %v538_v42, 0.0  ;;  %v542_v44 = vmul.f32 %v537_v16, %v534_v19 }
 0xd09   :  { %540 = vadd.xlane.f32.xlu1 %v539_v20 }
 0xd0a   :  { %v543_v21 = vsel %vm59_vm0, %v542_v44, 0.0 }
 0xd0b   :  { %544 = vadd.xlane.f32.xlu0 %v543_v21 }
 0xd96   :  { %v541_v22 = vpop.xlane.xlu1 %540 }
 0xd97   :  { %v546_v23 = vmax.f32 %v541_v22, 1e-20 }
 0xd98   :  { %v545_v27 = vpop.xlane.xlu0 %544 }
 0xd99   :  { %971 = vrcp.f32 %v546_v23 }
 0xda3   :  { %v972_v25 = vpop.eup %971 }
 0xda4   :  { %v548_v28 = vmul.f32 %v972_v25, %v545_v27 }
 0xda6   :  { %v549_v32 = vmul.f32 %v548_v28, %v537_v16 }
 0xda8   :  { %v550_v34 = vmul.f32 %v549_v32, %v1058_v29 }
 0xdaa   :  { %v551_v36 = vsub.f32 %v550_v34, %v534_v19 }
 0xdac   :  { %v555_v38 = vadd.f32 %v554_v35, %v551_v36 }
 0xdae   :  { %v557_v39 = vmul.f32 %v556_v37, %v555_v38 }
 0xdb0   :  { %v1218_v40 = vadd.f32 %v557_v39, %v1184_v8 }
 0xdb2   :  { %v566_v41 = vrot.slane %v1218_v40, 1  ;;  %v567_v43 = vrot.slane %v1218_v40, 7  ;;  %v563_v45 = vmul.f32 %v1218_v40, %v1218_v40  ;;  %v562_v47 = vmul.f32 %v1218_v40, %v1051_v18 }
 0xdb4   :  { %v568_v46 = vsub.f32 %v566_v41, %v567_v43  ;;  %v909_v48 = vadd.f32 -1.0, %v563_v45  ;;  %v630_v41 = vstv %s906_s7 }
 0xdb6   :  { %v569_v26 = vmul.f32 %v568_v46, %v568_v46  ;;  %v565_v49 = vmul.f32 %v909_v48, %v562_v47 }
 0xdb8   :  { %v570_v30 = vsel %vm59_vm0, %v569_v26, 0.0  ;;  %v573_v50 = vmul.f32 %v568_v46, %v565_v49 }
 0xdb9   :  { %571 = vadd.xlane.f32.xlu1 %v570_v30 }
 0xdba   :  { %v574_v8 = vsel %vm59_vm0, %v573_v50, 0.0 }
 0xdbb   :  { %575 = vadd.xlane.f32.xlu0 %v574_v8 }
 0xe46   :  { %v572_v33 = vpop.xlane.xlu1 %571 }
 0xe47   :  { %v577_v51 = vmax.f32 %v572_v33, 1e-20 }
 0xe48   :  { %v576_v52 = vpop.xlane.xlu0 %575 }
 0xe49   :  { %973 = vrcp.f32 %v577_v51 }
 0xe53   :  { %v974_v10 = vpop.eup %973 }
 0xe54   :  { %v579_v53 = vmul.f32 %v974_v10, %v576_v52 }
 0xe56   :  { %v580_v0 = vmul.f32 %v579_v53, %v568_v46 }
 0xe58   :  { %v581_v54 = vmul.f32 %v580_v0, %v1058_v29 }
 0xe5a   :  { %v1232_v56 = vsub.f32 %v581_v54, %v565_v49 }
 0xe5c   :  { %v584_v57 = vmul.f32 %v583_v55, %v1232_v56 }
 0xe5e   :  { %v585_v58 = vadd.f32 %v584_v57, %v1218_v40 }
 0xe60   :  { %v590_v60 = vrot.slane %v585_v58, 1  ;;  %v591_v61 = vrot.slane %v585_v58, 7  ;;  %v587_v63 = vmul.f32 %v585_v58, %v585_v58  ;;  %v586_v2 = vmul.f32 %v585_v58, %v1051_v18 }
 0xe62   :  { %v592_v1 = vsub.f32 %v590_v60, %v591_v61  ;;  %v910_v3 = vadd.f32 -1.0, %v587_v63 }
 0xe64   :  { %v593_v4 = vmul.f32 %v592_v1, %v592_v1  ;;  %v589_v5 = vmul.f32 %v910_v3, %v586_v2  ;;  %v658_v3 = vstv %s908_s8 }
 0xe66   :  { %v594_v6 = vsel %vm59_vm0, %v593_v4, 0.0  ;;  %v597_v7 = vmul.f32 %v592_v1, %v589_v5 }
 0xe67   :  { %595 = vadd.xlane.f32.xlu1 %v594_v6 }
 0xe68   :  { %v598_v9 = vsel %vm59_vm0, %v597_v7, 0.0 }
 0xe69   :  { %599 = vadd.xlane.f32.xlu0 %v598_v9 }
 0xef4   :  { %v596_v11 = vpop.xlane.xlu1 %595 }
 0xef5   :  { %v601_v12 = vmax.f32 %v596_v11, 1e-20 }
 0xef6   :  { %v600_v14 = vpop.xlane.xlu0 %599 }
 0xef7   :  { %975 = vrcp.f32 %v601_v12 }
 0xf01   :  { %v976_v13 = vpop.eup %975 }
 0xf02   :  { %v603_v15 = vmul.f32 %v976_v13, %v600_v14 }
 0xf04   :  { %v604_v59 = vmul.f32 %v603_v15, %v592_v1 }
 0xf06   :  { %v605_v16 = vmul.f32 %v604_v59, %v1058_v29 }
 0xf08   :  { %v606_v62 = vsub.f32 %v605_v16, %v589_v5 }
 0xf0a   :  { %v607_v17 = vmul.f32 %v606_v62, %v583_v55 }
 0xf0c   :  { %v608_v42 = vadd.f32 %v607_v17, %v1218_v40 }
 0xf0e   :  { %v613_v19 = vrot.slane %v608_v42, 1  ;;  %v614_v20 = vrot.slane %v608_v42, 7  ;;  %v610_v44 = vmul.f32 %v608_v42, %v608_v42  ;;  %v609_v22 = vmul.f32 %v608_v42, %v1051_v18 }
 0xf10   :  { %v615_v21 = vsub.f32 %v613_v19, %v614_v20  ;;  %v911_v23 = vadd.f32 -1.0, %v610_v44 }
 0xf12   :  { %v616_v24 = vmul.f32 %v615_v21, %v615_v21  ;;  %v612_v25 = vmul.f32 %v911_v23, %v609_v22  ;;  %v685_v22 = vstv %s1262_s9 }
 0xf14   :  { %v617_v27 = vsel %vm59_vm0, %v616_v24, 0.0  ;;  %v620_v28 = vmul.f32 %v615_v21, %v612_v25 }
 0xf15   :  { %618 = vadd.xlane.f32.xlu1 %v617_v27 }
 0xf16   :  { %v621_v31 = vsel %vm59_vm0, %v620_v28, 0.0 }
 0xf17   :  { %622 = vadd.xlane.f32.xlu0 %v621_v31 }
 0xfa2   :  { %v619_v32 = vpop.xlane.xlu1 %618 }
 0xfa3   :  { %v624_v34 = vmax.f32 %v619_v32, 1e-20 }
 0xfa4   :  { %v623_v36 = vpop.xlane.xlu0 %622 }
 0xfa5   :  { %977 = vrcp.f32 %v624_v34 }
 0xfaf   :  { %v978_v35 = vpop.eup %977 }
 0xfb0   :  { %v626_v37 = vmul.f32 %v978_v35, %v623_v36 }
 0xfb2   :  { %v627_v38 = vmul.f32 %v626_v37, %v615_v21 }
 0xfb4   :  { %v628_v39 = vmul.f32 %v627_v38, %v1058_v29 }
 0xfb6   :  { %v629_v43 = vsub.f32 %v628_v39, %v612_v25 }
 0xfb8   :  { %v631_v45 = vmul.f32 %v630_v41, %v629_v43  ;;  %v654_v54 = vadd.f32 %v629_v43, %v606_v62 }
 0xfba   :  { %v632_v46 = vadd.f32 %v631_v45, %v1218_v40  ;;  %v655_v60 = vmul.f32 2.0, %v654_v54 }
 0xfbc   :  { %v637_v47 = vrot.slane %v632_v46, 1  ;;  %v638_v48 = vrot.slane %v632_v46, 7  ;;  %v634_v26 = vmul.f32 %v632_v46, %v632_v46  ;;  %v633_v30 = vmul.f32 %v632_v46, %v1051_v18 }
 0xfbd   :  { %v656_v1 = vadd.f32 %v655_v60, %v1232_v56 }
 0xfbe   :  { %v639_v49 = vsub.f32 %v637_v47, %v638_v48  ;;  %v912_v50 = vadd.f32 -1.0, %v634_v26 }
 0xfc0   :  { %v640_v8 = vmul.f32 %v639_v49, %v639_v49  ;;  %v636_v33 = vmul.f32 %v912_v50, %v633_v30 }
 0xfc2   :  { %v641_v51 = vsel %vm59_vm0, %v640_v8, 0.0  ;;  %v644_v10 = vmul.f32 %v639_v49, %v636_v33 }
 0xfc3   :  { %642 = vadd.xlane.f32.xlu1 %v641_v51 }
 0xfc4   :  { %v645_v52 = vsel %vm59_vm0, %v644_v10, 0.0 }
 0xfc5   :  { %646 = vadd.xlane.f32.xlu0 %v645_v52 }
0x1050   :  { %v643_v53 = vpop.xlane.xlu1 %642 }
0x1051   :  { %v648_v0 = vmax.f32 %v643_v53, 1e-20 }
0x1052   :  { %v647_v57 = vpop.xlane.xlu0 %646 }
0x1053   :  { %979 = vrcp.f32 %v648_v0 }
0x105d   :  { %v980_v55 = vpop.eup %979 }
0x105e   :  { %v650_v58 = vmul.f32 %v980_v55, %v647_v57 }
0x1060   :  { %v651_v61 = vmul.f32 %v650_v58, %v639_v49 }
0x1062   :  { %v652_v63 = vmul.f32 %v651_v61, %v1058_v29 }
0x1064   :  { %v653_v2 = vsub.f32 %v652_v63, %v636_v33 }
0x1066   :  { %v657_v4 = vadd.f32 %v656_v1, %v653_v2 }
0x1068   :  { %v659_v5 = vmul.f32 %v658_v3, %v657_v4 }
0x106a   :  { %v1252_v6 = vadd.f32 %v659_v5, %v1218_v40 }
0x106c   :  { %v668_v7 = vrot.slane %v1252_v6, 1  ;;  %v669_v9 = vrot.slane %v1252_v6, 7  ;;  %v665_v11 = vmul.f32 %v1252_v6, %v1252_v6  ;;  %v664_v13 = vmul.f32 %v1252_v6, %v1051_v18 }
0x106e   :  { %v670_v12 = vsub.f32 %v668_v7, %v669_v9  ;;  %v916_v14 = vadd.f32 -1.0, %v665_v11  ;;  %v732_v7 = vstv %s913_s10 }
0x1070   :  { %v671_v56 = vmul.f32 %v670_v12, %v670_v12  ;;  %v667_v15 = vmul.f32 %v916_v14, %v664_v13 }
0x1072   :  { %v672_v59 = vsel %vm59_vm0, %v671_v56, 0.0  ;;  %v675_v16 = vmul.f32 %v670_v12, %v667_v15 }
0x1073   :  { %673 = vadd.xlane.f32.xlu1 %v672_v59 }
0x1074   :  { %v676_v40 = vsel %vm59_vm0, %v675_v16, 0.0 }
0x1075   :  { %677 = vadd.xlane.f32.xlu0 %v676_v40 }
0x1100   :  { %v674_v62 = vpop.xlane.xlu1 %673 }
0x1101   :  { %v679_v17 = vmax.f32 %v674_v62, 1e-20 }
0x1102   :  { %v678_v19 = vpop.xlane.xlu0 %677 }
0x1103   :  { %981 = vrcp.f32 %v679_v17 }
0x110d   :  { %v982_v42 = vpop.eup %981 }
0x110e   :  { %v681_v20 = vmul.f32 %v982_v42, %v678_v19 }
0x1110   :  { %v682_v44 = vmul.f32 %v681_v20, %v670_v12 }
0x1112   :  { %v683_v21 = vmul.f32 %v682_v44, %v1058_v29 }
0x1114   :  { %v1266_v23 = vsub.f32 %v683_v21, %v667_v15 }
0x1116   :  { %v686_v24 = vmul.f32 %v685_v22, %v1266_v23 }
0x1118   :  { %v687_v25 = vadd.f32 %v686_v24, %v1252_v6 }
0x111a   :  { %v692_v27 = vrot.slane %v687_v25, 1  ;;  %v693_v28 = vrot.slane %v687_v25, 7  ;;  %v689_v31 = vmul.f32 %v687_v25, %v687_v25  ;;  %v688_v34 = vmul.f32 %v687_v25, %v1051_v18 }
0x111c   :  { %v694_v32 = vsub.f32 %v692_v27, %v693_v28  ;;  %v917_v35 = vadd.f32 -1.0, %v689_v31 }
0x111e   :  { %v695_v36 = vmul.f32 %v694_v32, %v694_v32  ;;  %v691_v37 = vmul.f32 %v917_v35, %v688_v34  ;;  %v760_v35 = vstv %s915_s11 }
0x1120   :  { %v696_v38 = vsel %vm59_vm0, %v695_v36, 0.0  ;;  %v699_v39 = vmul.f32 %v694_v32, %v691_v37 }
0x1121   :  { %697 = vadd.xlane.f32.xlu1 %v696_v38 }
0x1122   :  { %v700_v41 = vsel %vm59_vm0, %v699_v39, 0.0 }
0x1123   :  { %701 = vadd.xlane.f32.xlu0 %v700_v41 }
0x11ae   :  { %v698_v43 = vpop.xlane.xlu1 %697 }
0x11af   :  { %v703_v45 = vmax.f32 %v698_v43, 1e-20 }
0x11b0   :  { %v702_v47 = vpop.xlane.xlu0 %701 }
0x11b1   :  { %983 = vrcp.f32 %v703_v45 }
0x11bb   :  { %v984_v46 = vpop.eup %983 }
0x11bc   :  { %v705_v48 = vmul.f32 %v984_v46, %v702_v47 }
0x11be   :  { %v706_v26 = vmul.f32 %v705_v48, %v694_v32 }
0x11c0   :  { %v707_v49 = vmul.f32 %v706_v26, %v1058_v29 }
0x11c2   :  { %v708_v30 = vsub.f32 %v707_v49, %v691_v37 }
0x11c4   :  { %v709_v50 = vmul.f32 %v708_v30, %v685_v22 }
0x11c6   :  { %v710_v8 = vadd.f32 %v709_v50, %v1252_v6 }
0x11c8   :  { %v715_v33 = vrot.slane %v710_v8, 1  ;;  %v716_v51 = vrot.slane %v710_v8, 7  ;;  %v712_v10 = vmul.f32 %v710_v8, %v710_v8  ;;  %v711_v53 = vmul.f32 %v710_v8, %v1051_v18 }
0x11ca   :  { %v717_v52 = vsub.f32 %v715_v33, %v716_v51  ;;  %v918_v0 = vadd.f32 -1.0, %v712_v10 }
0x11cc   :  { %v718_v54 = vmul.f32 %v717_v52, %v717_v52  ;;  %v714_v55 = vmul.f32 %v918_v0, %v711_v53  ;;  %v787_v53 = vstv %s1296_s12 }
0x11ce   :  { %v719_v57 = vsel %vm59_vm0, %v718_v54, 0.0  ;;  %v722_v58 = vmul.f32 %v717_v52, %v714_v55 }
0x11cf   :  { %720 = vadd.xlane.f32.xlu1 %v719_v57 }
0x11d0   :  { %v723_v60 = vsel %vm59_vm0, %v722_v58, 0.0 }
0x11d1   :  { %724 = vadd.xlane.f32.xlu0 %v723_v60 }
0x125c   :  { %v721_v61 = vpop.xlane.xlu1 %720 }
0x125d   :  { %v726_v63 = vmax.f32 %v721_v61, 1e-20 }
0x125e   :  { %v725_v2 = vpop.xlane.xlu0 %724 }
0x125f   :  { %985 = vrcp.f32 %v726_v63 }
0x1269   :  { %v986_v1 = vpop.eup %985 }
0x126a   :  { %v728_v3 = vmul.f32 %v986_v1, %v725_v2 }
0x126c   :  { %v729_v4 = vmul.f32 %v728_v3, %v717_v52 }
0x126e   :  { %v730_v5 = vmul.f32 %v729_v4, %v1058_v29 }
0x1270   :  { %v731_v9 = vsub.f32 %v730_v5, %v714_v55 }
0x1272   :  { %v733_v11 = vmul.f32 %v732_v7, %v731_v9  ;;  %v756_v21 = vadd.f32 %v731_v9, %v708_v30 }
0x1274   :  { %v734_v12 = vadd.f32 %v733_v11, %v1252_v6  ;;  %v757_v27 = vmul.f32 2.0, %v756_v21 }
0x1276   :  { %v739_v13 = vrot.slane %v734_v12, 1  ;;  %v740_v14 = vrot.slane %v734_v12, 7  ;;  %v736_v56 = vmul.f32 %v734_v12, %v734_v12  ;;  %v735_v59 = vmul.f32 %v734_v12, %v1051_v18 }
0x1277   :  { %v758_v32 = vadd.f32 %v757_v27, %v1266_v23 }
0x1278   :  { %v741_v15 = vsub.f32 %v739_v13, %v740_v14  ;;  %v919_v16 = vadd.f32 -1.0, %v736_v56 }
0x127a   :  { %v742_v40 = vmul.f32 %v741_v15, %v741_v15  ;;  %v738_v62 = vmul.f32 %v919_v16, %v735_v59 }
0x127c   :  { %v743_v17 = vsel %vm59_vm0, %v742_v40, 0.0  ;;  %v746_v42 = vmul.f32 %v741_v15, %v738_v62 }
0x127d   :  { %744 = vadd.xlane.f32.xlu1 %v743_v17 }
0x127e   :  { %v747_v19 = vsel %vm59_vm0, %v746_v42, 0.0 }
0x127f   :  { %748 = vadd.xlane.f32.xlu0 %v747_v19 }
0x130a   :  { %v745_v20 = vpop.xlane.xlu1 %744 }
0x130b   :  { %v750_v44 = vmax.f32 %v745_v20, 1e-20 }
0x130c   :  { %v749_v24 = vpop.xlane.xlu0 %748 }
0x130d   :  { %987 = vrcp.f32 %v750_v44 }
0x1317   :  { %v988_v22 = vpop.eup %987 }
0x1318   :  { %v752_v25 = vmul.f32 %v988_v22, %v749_v24 }
0x131a   :  { %v753_v28 = vmul.f32 %v752_v25, %v741_v15 }
0x131c   :  { %v754_v31 = vmul.f32 %v753_v28, %v1058_v29 }
0x131e   :  { %v755_v34 = vsub.f32 %v754_v31, %v738_v62 }
0x1320   :  { %v759_v36 = vadd.f32 %v758_v32, %v755_v34 }
0x1322   :  { %v761_v37 = vmul.f32 %v760_v35, %v759_v36 }
0x1324   :  { %v1286_v38 = vadd.f32 %v761_v37, %v1252_v6 }
0x1326   :  { %v770_v39 = vrot.slane %v1286_v38, 1  ;;  %v771_v41 = vrot.slane %v1286_v38, 7  ;;  %v767_v43 = vmul.f32 %v1286_v38, %v1286_v38  ;;  %v766_v46 = vmul.f32 %v1286_v38, %v1051_v18 }
0x1328   :  { %v772_v45 = vsub.f32 %v770_v39, %v771_v41  ;;  %v923_v47 = vadd.f32 -1.0, %v767_v43  ;;  %v834_v39 = vstv %s920_s13 }
0x132a   :  { %v773_v23 = vmul.f32 %v772_v45, %v772_v45  ;;  %v769_v48 = vmul.f32 %v923_v47, %v766_v46 }
0x132c   :  { %v774_v26 = vsel %vm59_vm0, %v773_v23, 0.0  ;;  %v777_v49 = vmul.f32 %v772_v45, %v769_v48 }
0x132d   :  { %775 = vadd.xlane.f32.xlu1 %v774_v26 }
0x132e   :  { %v778_v6 = vsel %vm59_vm0, %v777_v49, 0.0 }
0x132f   :  { %779 = vadd.xlane.f32.xlu0 %v778_v6 }
0x13ba   :  { %v776_v30 = vpop.xlane.xlu1 %775 }
0x13bb   :  { %v781_v50 = vmax.f32 %v776_v30, 1e-20 }
0x13bc   :  { %v780_v33 = vpop.xlane.xlu0 %779 }
0x13bd   :  { %989 = vrcp.f32 %v781_v50 }
0x13c7   :  { %v990_v8 = vpop.eup %989 }
0x13c8   :  { %v783_v51 = vmul.f32 %v990_v8, %v780_v33 }
0x13ca   :  { %v784_v10 = vmul.f32 %v783_v51, %v772_v45 }
0x13cc   :  { %v785_v52 = vmul.f32 %v784_v10, %v1058_v29 }
0x13ce   :  { %v1300_v0 = vsub.f32 %v785_v52, %v769_v48 }
0x13d0   :  { %v788_v54 = vmul.f32 %v787_v53, %v1300_v0 }
0x13d2   :  { %v789_v55 = vadd.f32 %v788_v54, %v1286_v38 }
0x13d4   :  { %v794_v57 = vrot.slane %v789_v55, 1  ;;  %v795_v58 = vrot.slane %v789_v55, 7  ;;  %v791_v60 = vmul.f32 %v789_v55, %v789_v55  ;;  %v790_v63 = vmul.f32 %v789_v55, %v1051_v18 }
0x13d6   :  { %v796_v61 = vsub.f32 %v794_v57, %v795_v58  ;;  %v924_v1 = vadd.f32 -1.0, %v791_v60 }
0x13d8   :  { %v797_v2 = vmul.f32 %v796_v61, %v796_v61  ;;  %v793_v3 = vmul.f32 %v924_v1, %v790_v63  ;;  %v862_v63 = vstv %s922_s14 }
0x13da   :  { %v798_v4 = vsel %vm59_vm0, %v797_v2, 0.0  ;;  %v801_v5 = vmul.f32 %v796_v61, %v793_v3 }
0x13db   :  { %799 = vadd.xlane.f32.xlu1 %v798_v4 }
0x13dc   :  { %v802_v7 = vsel %vm59_vm0, %v801_v5, 0.0 }
0x13dd   :  { %803 = vadd.xlane.f32.xlu0 %v802_v7 }
0x1468   :  { %v800_v9 = vpop.xlane.xlu1 %799 }
0x1469   :  { %v805_v11 = vmax.f32 %v800_v9, 1e-20 }
0x146a   :  { %v804_v13 = vpop.xlane.xlu0 %803 }
0x146b   :  { %991 = vrcp.f32 %v805_v11 }
0x1475   :  { %v992_v12 = vpop.eup %991 }
0x1476   :  { %v807_v14 = vmul.f32 %v992_v12, %v804_v13 }
0x1478   :  { %v808_v56 = vmul.f32 %v807_v14, %v796_v61 }
0x147a   :  { %v809_v15 = vmul.f32 %v808_v56, %v1058_v29 }
0x147c   :  { %v810_v59 = vsub.f32 %v809_v15, %v793_v3 }
0x147e   :  { %v811_v16 = vmul.f32 %v810_v59, %v787_v53 }
0x1480   :  { %v812_v40 = vadd.f32 %v811_v16, %v1286_v38 }
0x1482   :  { %v817_v62 = vrot.slane %v812_v40, 1  ;;  %v818_v17 = vrot.slane %v812_v40, 7  ;;  %v814_v42 = vmul.f32 %v812_v40, %v812_v40  ;;  %v813_v20 = vmul.f32 %v812_v40, %v1051_v18 }
0x1484   :  { %v819_v19 = vsub.f32 %v817_v62, %v818_v17  ;;  %v925_v44 = vadd.f32 -1.0, %v814_v42 }
0x1486   :  { %v820_v21 = vmul.f32 %v819_v19, %v819_v19  ;;  %v816_v22 = vmul.f32 %v925_v44, %v813_v20 }
0x1488   :  { %v821_v24 = vsel %vm59_vm0, %v820_v21, 0.0  ;;  %v824_v25 = vmul.f32 %v819_v19, %v816_v22 }
0x1489   :  { %822 = vadd.xlane.f32.xlu1 %v821_v24 }
0x148a   :  { %v825_v27 = vsel %vm59_vm0, %v824_v25, 0.0 }
0x148b   :  { %826 = vadd.xlane.f32.xlu0 %v825_v27 }
0x1516   :  { %v823_v28 = vpop.xlane.xlu1 %822 }
0x1517   :  { %v828_v31 = vmax.f32 %v823_v28, 1e-20 }
0x1518   :  { %v827_v34 = vpop.xlane.xlu0 %826 }
0x1519   :  { %993 = vrcp.f32 %v828_v31 }
0x1523   :  { %v994_v32 = vpop.eup %993 }
0x1524   :  { %v830_v35 = vmul.f32 %v994_v32, %v827_v34 }
0x1526   :  { %v831_v36 = vmul.f32 %v830_v35, %v819_v19 }
0x1528   :  { %v832_v37 = vmul.f32 %v831_v36, %v1058_v29 }
0x152a   :  { %v833_v41 = vsub.f32 %v832_v37, %v816_v22 }
0x152c   :  { %v835_v43 = vmul.f32 %v834_v39, %v833_v41  ;;  %v858_v52 = vadd.f32 %v833_v41, %v810_v59 }
0x152e   :  { %v836_v45 = vadd.f32 %v835_v43, %v1286_v38  ;;  %v859_v57 = vmul.f32 2.0, %v858_v52 }
0x1530   :  { %v841_v46 = vrot.slane %v836_v45, 1  ;;  %v842_v47 = vrot.slane %v836_v45, 7  ;;  %v838_v23 = vmul.f32 %v836_v45, %v836_v45  ;;  %v837_v26 = vmul.f32 %v836_v45, %v1051_v18 }
0x1531   :  { %v860_v60 = vadd.f32 %v859_v57, %v1300_v0 }
0x1532   :  { %v843_v48 = vsub.f32 %v841_v46, %v842_v47  ;;  %v926_v49 = vadd.f32 -1.0, %v838_v23 }
0x1534   :  { %v844_v6 = vmul.f32 %v843_v48, %v843_v48  ;;  %v840_v30 = vmul.f32 %v926_v49, %v837_v26 }
0x1536   :  { %v845_v50 = vsel %vm59_vm0, %v844_v6, 0.0  ;;  %v848_v8 = vmul.f32 %v843_v48, %v840_v30 }
0x1537   :  { %846 = vadd.xlane.f32.xlu1 %v845_v50 }
0x1538   :  { %v849_v33 = vsel %vm59_vm0, %v848_v8, 0.0 }
0x1539   :  { %850 = vadd.xlane.f32.xlu0 %v849_v33 }
0x15c4   :  { %v847_v51 = vpop.xlane.xlu1 %846 }
0x15c5   :  { %v852_v10 = vmax.f32 %v847_v51, 1e-20 }
0x15c6   :  { %v851_v54 = vpop.xlane.xlu0 %850 }
0x15c7   :  { %995 = vrcp.f32 %v852_v10 }
0x15d1   :  { %v996_v53 = vpop.eup %995 }
0x15d2   :  { %v854_v55 = vmul.f32 %v996_v53, %v851_v54 }
0x15d4   :  { %v855_v18 = vmul.f32 %v854_v55, %v843_v48 }
0x15d6   :  { %v856_v58 = vmul.f32 %v855_v18, %v1058_v29 }
0x15d8   :  { %v857_v61 = vsub.f32 %v856_v58, %v840_v30 }
0x15da   :  { %v861_v1 = vadd.f32 %v860_v60, %v857_v61 }
0x15dc   :  { %v863_v2 = vmul.f32 %v862_v63, %v861_v1 }
0x15de   :  { %v864_v3 = vadd.f32 %v863_v2, %v1286_v38 }
0x15e0   :  { %865 = vst.msk [vmem:[%s1327_s3] sm:$0xff] %vm59_vm0, %v864_v3 }
0x15e1   :  { %870 = vsyncpa [#allocation3], 1 }

</bundles_post_ra>
